<compile_context>
chip_gen: v7x
topology: tpu7x:2x2x1
jax: 0.10.0
libtpu: 0.0.40
codegen_flags: <defaults>
</compile_context>

<pallas_src>
import jax
import jax.numpy as jnp
from jax import lax
from jax.experimental import pallas as pl
from jax.experimental.pallas import tpu as pltpu

NUM_FUSE = 4      # LaneGCN uses 4 fuse iterations
EPS = 1e-5        # torch nn.GroupNorm default eps


def _group_norm(x, gamma, beta):
    # nn.GroupNorm(num_groups=1, C) on [N, C]: per-row mean/var over all channels
    # (biased var), then per-channel affine.  Pure jnp -> usable in-kernel and at trace.
    mean = jnp.mean(x, axis=-1, keepdims=True)
    var = jnp.mean(jnp.square(x - mean), axis=-1, keepdims=True)
    return (x - mean) * lax.rsqrt(var + EPS) * gamma + beta


# ----------------------------------------------------------------------------- kernels


def mapnet_fused_kernel(feat0_ref, w_ctr_ref, w_edge_ref, w_ctr2_ref,
                        g_norm_ref, b_norm_ref, g_ctr2_ref, b_ctr2_ref,
                        adj_ref, out_ref, feat_sc):
    """Whole MapNet fuse loop in ONE grid step (adjacency resident in VMEM).

    adj_ref: (E, N, N) bf16; w_edge_ref: (NUM_FUSE*E, C, C) bf16;
    w_ctr_ref / w_ctr2_ref: (NUM_FUSE, C, C) bf16; norm params: (NUM_FUSE, 1, C) f32.
    """
    n_edge = adj_ref.shape[0]

    feat_sc[...] = feat0_ref[...]

    def fuse_step(f, carry):
        feat = feat_sc[...]                       # residual (res = feat at iter start)
        feat_b = feat.astype(jnp.bfloat16)
        # temp = fuse['ctr'][f](feat)
        temp = jnp.dot(feat_b, w_ctr_ref[f], preferred_element_type=jnp.float32)
        # temp += sum_e A_e @ (feat @ W_e)  -- per-edge [N,C]@[C,C] then [N,N]@[N,C],
        # all bf16 on the MXU with f32 accumulation (no wide intermediate).
        for e in range(n_edge):
            y_e = jnp.dot(feat_b, w_edge_ref[f * n_edge + e],
                          preferred_element_type=jnp.float32).astype(jnp.bfloat16)
            temp = temp + jnp.dot(adj_ref[e], y_e, preferred_element_type=jnp.float32)
        # norm -> relu -> ctr2 (Linear + GN) -> += res -> relu
        h = jnp.maximum(_group_norm(temp, g_norm_ref[f], b_norm_ref[f]), 0.0)
        h = _group_norm(jnp.dot(h.astype(jnp.bfloat16), w_ctr2_ref[f],
                                preferred_element_type=jnp.float32),
                        g_ctr2_ref[f], b_ctr2_ref[f])
        feat_sc[...] = jnp.maximum(h + feat, 0.0)
        return carry

    lax.fori_loop(0, NUM_FUSE, fuse_step, 0)
    out_ref[...] = feat_sc[...]


def mapnet_streamed_kernel(feat0_ref, w_ctr_ref, w_edge_ref, w_ctr2_ref,
                           g_norm_ref, b_norm_ref, g_ctr2_ref, b_ctr2_ref,
                           adj_ref, out_ref, feat_sc, temp_sc, y_sc):
    """grid=(NUM_FUSE, k_tiles); adjacency (N, E*N) bf16 streamed in (N, tile_k) tiles."""
    f = pl.program_id(0)
    k = pl.program_id(1)
    nk = pl.num_programs(1)

    n_nodes, n_map = feat_sc.shape
    n_edge = y_sc.shape[0] // n_nodes
    tile_k = adj_ref.shape[1]

    @pl.when(jnp.logical_and(f == 0, k == 0))
    def _init():
        feat_sc[...] = feat0_ref[...]

    @pl.when(k == 0)
    def _start():
        feat_b = feat_sc[...].astype(jnp.bfloat16)
        # temp = fuse['ctr'][f](feat)
        temp_sc[...] = jnp.dot(feat_b, w_ctr_ref[0],
                               preferred_element_type=jnp.float32)
        # Y_stack[e*N:(e+1)*N, :] = feat @ W_e  (per-edge matmuls straight into bf16
        # scratch slices; no N x E*C f32 intermediate)
        for e in range(n_edge):
            y_sc[e * n_nodes:(e + 1) * n_nodes, :] = jnp.dot(
                feat_b, w_edge_ref[0, e],
                preferred_element_type=jnp.float32).astype(jnp.bfloat16)

    # temp += adj_cat[:, k_tile] @ Y_stack[k_tile, :]   (long-K, bf16 MXU, f32 acc)
    kstart = pl.multiple_of(k * tile_k, tile_k)
    temp_sc[...] += jnp.dot(adj_ref[...], y_sc[pl.ds(kstart, tile_k), :],
                            preferred_element_type=jnp.float32)

    @pl.when(k == nk - 1)
    def _finish():
        h = jnp.maximum(_group_norm(temp_sc[...], g_norm_ref[0], b_norm_ref[0]), 0.0)
        h = _group_norm(jnp.dot(h.astype(jnp.bfloat16), w_ctr2_ref[0],
                                preferred_element_type=jnp.float32),
                        g_ctr2_ref[0], b_ctr2_ref[0])
        new_feat = jnp.maximum(h + feat_sc[...], 0.0)
        feat_sc[...] = new_feat
        out_ref[...] = new_feat


# ----------------------------------------------------------------------------- wrapper


def _vmem_capacity_bytes():
    try:
        return int(pltpu.get_tpu_info().vmem_capacity_bytes)
    except Exception:  # query unavailable -> be v7x-safe
        return 64 << 20


def _full_block_spec(shape):
    nd = len(shape)

    def idx(i):
        return (0,) * nd

    return pl.BlockSpec(shape, idx)


def _pick_tile_k(n_nodes, n_map, n_edge, vmem_cap, n_buf=3):
    """Largest 128-multiple divisor of E*N whose n_buf-deep (N, tile_k) bf16 stream
    buffers fit the VMEM left over by the resident working set.  No artificial cap."""
    total_k = n_edge * n_nodes
    resident = (2 * n_nodes * n_map * 4                       # feat_sc + temp_sc (f32)
                + n_edge * n_nodes * n_map * 2                # y_sc (bf16)
                + 3 * n_nodes * n_map * 4                     # feat0 + out buffers
                + 2 * (2 * n_map * n_map * 2                  # w_ctr + w_ctr2 (bf16, 2x)
                       + n_edge * n_map * n_map * 2           # w_edge (bf16, 2x)
                       + 4 * n_map * 4))                      # norm params (f32, 2x)
    budget = int(0.8 * vmem_cap) - resident
    budget = max(budget, n_buf * n_nodes * 128 * 2)           # always allow tile_k=128
    max_tile = max(128, (budget // (n_buf * n_nodes * 2) // 128) * 128)
    cands = [t for t in range(128, total_k + 1, 128) if total_k % t == 0]
    fitting = [t for t in cands if t <= max_tile]
    # Guarded fallback: N is padded to a multiple of 128, so 128 always divides E*N.
    return max(fitting) if fitting else 128


def mapnet_forward(ctrs, feats, params, adj_dense, *, force_streamed=False, tile_k=None):
    """MapNet forward.  adj_dense[e, u, v] = multiplicity of edge (u <- v) of type e
    (index_add_(0, u, W_e(feat[v])) == A_e @ (feat @ W_e); edge Linears are bias-free).

    Host-side glue from the PyTorch module (the empty-graph early exit and the
    pass-through of graph['idcs'] / graph['ctrs']) is intentionally not kernel work.
    NOTE: adjacency is stored bf16 (exact for integer multiplicities <= 256 -- validate
    offline, not per-call) and all matmuls run bf16 on the MXU with f32 accumulation,
    so results match the f32 PyTorch reference to ~1e-2 relative tolerance only.
    """
    n_real = ctrs.shape[0]
    C = params["w_in2"].shape[0]
    E = adj_dense.shape[0]
    assert C % 128 == 0, "n_map must be a multiple of 128 (lane-dense channels)"

    # ---- input / seg MLPs in plain JAX f32 (tiny; keeps the (N,2) lane-padded blocks
    # ---- and their weights out of the kernel, shrinking its fixed VMEM footprint).
    x = jnp.maximum(ctrs @ params["w_in1"] + params["b_in1"], 0.0)
    x = _group_norm(x @ params["w_in2"], params["g_in"], params["be_in"])
    s = jnp.maximum(feats @ params["w_seg1"] + params["b_seg1"], 0.0)
    s = _group_norm(s @ params["w_seg2"], params["g_seg"], params["be_seg"])
    feat0 = jnp.maximum(x + s, 0.0)

    # ---- pad node count to a multiple of 128 (zero rows/cols -> exact for real rows)
    N = ((n_real + 127) // 128) * 128
    if N != n_real:
        feat0 = jnp.pad(feat0, ((0, N - n_real), (0, 0)))
        adj_dense = jnp.pad(adj_dense, ((0, 0), (0, N - n_real), (0, N - n_real)))

    # ---- fuse-loop weights: bf16 once in HBM; GroupNorm affine params stay f32 ------
    w_ctr = params["w_ctr"].astype(jnp.bfloat16)                    # (F, C, C)
    w_ctr2 = params["w_ctr2"].astype(jnp.bfloat16)                  # (F, C, C)
    w_edge = params["w_edge"].astype(jnp.bfloat16)                  # (F, E, C, C)
    g_norm = params["g_norm"].reshape(NUM_FUSE, 1, C)
    b_norm = params["b_norm"].reshape(NUM_FUSE, 1, C)
    g_ctr2 = params["g_ctr2"].reshape(NUM_FUSE, 1, C)
    b_ctr2 = params["b_ctr2"].reshape(NUM_FUSE, 1, C)

    vmem_cap = _vmem_capacity_bytes()
    # Headroom for Mosaic internal scratch / input double buffers: 0.85x capacity
    # (~54 MiB on v7x, ~108 MiB on v5e/v6e) rather than the full physical VMEM.
    vmem_limit = int(0.85 * vmem_cap)

    weight_bytes = (2 * NUM_FUSE * C * C * 2 + NUM_FUSE * E * C * C * 2
                    + 4 * NUM_FUSE * C * 4)
    fused_need = (2 * (E * N * N * 2 + N * C * 4 + weight_bytes)   # inputs (2 bufs)
                  + 3 * N * C * 4)                                 # feat_sc + out
    use_fused = (not force_streamed) and fused_need <= int(0.55 * vmem_cap)

    if use_fused:
        # Adjacency resident as (E, N, N) bf16; whole fuse loop in one grid step.
        adj3 = adj_dense.astype(jnp.bfloat16)
        w_edge_flat = w_edge.reshape(NUM_FUSE * E, C, C)
        inputs = (feat0, w_ctr, w_edge_flat, w_ctr2,
                  g_norm, b_norm, g_ctr2, b_ctr2, adj3)
        out = pl.pallas_call(
            mapnet_fused_kernel,
            out_shape=jax.ShapeDtypeStruct((N, C), jnp.float32),
            grid=(1,),
            in_specs=[_full_block_spec(a.shape) for a in inputs],
            out_specs=_full_block_spec((N, C)),
            scratch_shapes=[pltpu.VMEM((N, C), jnp.float32)],
            compiler_params=pltpu.CompilerParams(
                dimension_semantics=("arbitrary",),
                vmem_limit_bytes=vmem_limit),
        )(*inputs)
        return out[:n_real]

    # -------- streamed fallback: adjacency does not fit resident ----------------------
    resident_min = (2 * N * C * 4 + E * N * C * 2 + 3 * N * C * 4
                    + 2 * (2 * C * C * 2 + E * C * C * 2 + 4 * C * 4)
                    + 3 * N * 128 * 2)
    if resident_min > vmem_limit:
        raise NotImplementedError(
            "graph too large for the dense-adjacency formulation; "
            "TODO(synk): CSR/scalar-prefetch edge-list kernel")

    if tile_k is None:
        tile_k = _pick_tile_k(N, C, E, vmem_cap)
    assert tile_k % 128 == 0 and (E * N) % tile_k == 0
    k_tiles = (E * N) // tile_k

    # Fold edge type into the contraction axis: adj_cat[u, e*N + v] = A[e][u, v]
    adj_cat = adj_dense.transpose(1, 0, 2).reshape(N, E * N).astype(jnp.bfloat16)

    c2 = lambda f, k: (0, 0)
    f3 = lambda f, k: (f, 0, 0)
    f4 = lambda f, k: (f, 0, 0, 0)

    def _adj_spec():
        idx = lambda f, k: (0, k)
        if k_tiles >= 3:
            try:  # deeper adjacency buffering hides exposed DMA (helps v5e most)
                return pl.BlockSpec((N, tile_k), idx, pipeline_mode=pl.Buffered(3))
            except Exception:
                pass
        return pl.BlockSpec((N, tile_k), idx)

    in_specs = [
        pl.BlockSpec((N, C), c2),            # feat0
        pl.BlockSpec((1, C, C), f3),         # w_ctr   (per fuse iter, bf16)
        pl.BlockSpec((1, E, C, C), f4),      # w_edge  (per fuse iter, bf16)
        pl.BlockSpec((1, C, C), f3),         # w_ctr2  (per fuse iter, bf16)
        pl.BlockSpec((1, 1, C), f3),         # g_norm
        pl.BlockSpec((1, 1, C), f3),         # b_norm
        pl.BlockSpec((1, 1, C), f3),         # g_ctr2
        pl.BlockSpec((1, 1, C), f3),         # b_ctr2
        _adj_spec(),                         # adj_cat, streamed over k
    ]
    inputs = (feat0, w_ctr, w_edge, w_ctr2, g_norm, b_norm, g_ctr2, b_ctr2, adj_cat)

    out = pl.pallas_call(
        mapnet_streamed_kernel,
        out_shape=jax.ShapeDtypeStruct((N, C), jnp.float32),
        grid=(NUM_FUSE, k_tiles),
        in_specs=in_specs,
        out_specs=pl.BlockSpec((N, C), c2),
        scratch_shapes=[pltpu.VMEM((N, C), jnp.float32),       # feat (== residual)
                        pltpu.VMEM((N, C), jnp.float32),       # temp accumulator
                        pltpu.VMEM((E * N, C), jnp.bfloat16)], # Y_stack
        compiler_params=pltpu.CompilerParams(
            dimension_semantics=("arbitrary", "arbitrary"),
            vmem_limit_bytes=vmem_limit),
    )(*inputs)
    return out[:n_real]


# ----------------------------------------------------------------------------- helpers


def mapnet_reference(ctrs, feats, params, adj_dense):
    """Pure-JAX f32 reference of the PyTorch forward (for tolerance checks)."""
    x = jnp.maximum(ctrs @ params["w_in1"] + params["b_in1"], 0.0)
    x = _group_norm(x @ params["w_in2"], params["g_in"], params["be_in"])
    s = jnp.maximum(feats @ params["w_seg1"] + params["b_seg1"], 0.0)
    s = _group_norm(s @ params["w_seg2"], params["g_seg"], params["be_seg"])
    feat = jnp.maximum(x + s, 0.0)
    res = feat
    E = adj_dense.shape[0]
    for i in range(NUM_FUSE):
        temp = feat @ params["w_ctr"][i]
        for e in range(E):
            temp = temp + adj_dense[e] @ (feat @ params["w_edge"][i, e])
        feat = jnp.maximum(
            _group_norm(temp, params["g_norm"][i], params["b_norm"][i]), 0.0)
        feat = _group_norm(feat @ params["w_ctr2"][i],
                           params["g_ctr2"][i], params["b_ctr2"][i])
        feat = jnp.maximum(feat + res, 0.0)
        res = feat
    return feat


def make_params(key, n_map, num_edge_types):
    ks = list(jax.random.split(key, 16))
    nrm = lambda k, shape, scale=0.1: (scale * jax.random.normal(k, shape)).astype(jnp.float32)
    return {
        # input branch: Linear(2, C) [w,b], Linear(C, C, bias=False), GroupNorm(1, C)
        "w_in1": nrm(ks[0], (2, n_map)),
        "b_in1": nrm(ks[1], (1, n_map)),
        "w_in2": nrm(ks[2], (n_map, n_map)),
        "g_in": jnp.ones((1, n_map), jnp.float32),
        "be_in": jnp.zeros((1, n_map), jnp.float32),
        # seg branch
        "w_seg1": nrm(ks[3], (2, n_map)),
        "b_seg1": nrm(ks[4], (1, n_map)),
        "w_seg2": nrm(ks[5], (n_map, n_map)),
        "g_seg": jnp.ones((1, n_map), jnp.float32),
        "be_seg": jnp.zeros((1, n_map), jnp.float32),
        # fuse layers (4 of each)
        "w_ctr": nrm(ks[6], (NUM_FUSE, n_map, n_map)),
        "w_edge": nrm(ks[7], (NUM_FUSE, num_edge_types, n_map, n_map)),
        "g_norm": jnp.ones((NUM_FUSE, n_map), jnp.float32),
        "b_norm": jnp.zeros((NUM_FUSE, n_map), jnp.float32),
        "w_ctr2": nrm(ks[8], (NUM_FUSE, n_map, n_map)),
        "g_ctr2": jnp.ones((NUM_FUSE, n_map), jnp.float32),
        "b_ctr2": jnp.zeros((NUM_FUSE, n_map), jnp.float32),
    }


def make_adjacency(key, num_edge_types, n_nodes, n_edges):
    # Dense adjacency per edge type: A[e][u, v] = #edges (u <- v) of type e.
    keys = jax.random.split(key, 2 * num_edge_types)
    mats = []
    for e in range(num_edge_types):
        u = jax.random.randint(keys[2 * e], (n_edges,), 0, n_nodes)
        v = jax.random.randint(keys[2 * e + 1], (n_edges,), 0, n_nodes)
        mats.append(jnp.zeros((n_nodes, n_nodes), jnp.float32).at[u, v].add(1.0))
    return jnp.stack(mats, axis=0)


if __name__ == "__main__":
    # Small synthetic graph consistent with MapNet's forward:
    #   N lane nodes, 2-d centers + 2-d segment feats, n_map hidden channels,
    #   edge types = {pre_i, suc_i} x num_scales + {left, right}.
    N = 128
    n_map = 128
    num_scales = 2
    n_edges = 256                        # edges per edge type
    num_edge_types = 2 * num_scales + 2  # pre0, pre1, suc0, suc1, left, right

    root = jax.random.PRNGKey(0)
    k_ctrs, k_feats, k_params, k_adj = jax.random.split(root, 4)

    ctrs = jax.random.normal(k_ctrs, (N, 2), jnp.float32)     # torch.cat(graph['ctrs'], 0)
    feats = jax.random.normal(k_feats, (N, 2), jnp.float32)   # graph['feats']
    params = make_params(k_params, n_map, num_edge_types)
    adj = make_adjacency(k_adj, num_edge_types, N, n_edges)

    # bf16 adjacency storage is exact for integer multiplicities <= 256 (checked once
    # here, outside the forward hot path -> no per-call host sync).
    assert float(jnp.max(adj)) <= 256.0

    out = mapnet_forward(ctrs, feats, params, adj)                          # fused path
    out_stream = mapnet_forward(ctrs, feats, params, adj,
                                force_streamed=True, tile_k=256)            # streamed path
    ref = mapnet_reference(ctrs, feats, params, adj)
    jax.block_until_ready((out, out_stream, ref))

    assert out.shape == (N, n_map) and out.dtype == jnp.float32
    assert bool(jnp.all(jnp.isfinite(out)))
    # fused and streamed kernels share identical bf16 math -> tight agreement
    assert float(jnp.max(jnp.abs(out - out_stream))) < 1e-2
    # bf16-on-MXU vs f32 reference -> loose, documented tolerance
    scale = float(jnp.max(jnp.abs(ref))) + 1e-3
    assert float(jnp.max(jnp.abs(out - ref))) / scale < 5e-2

    # Forward also returns graph['idcs'] and graph['ctrs'] unchanged and has a host-side
    # empty-graph early-exit branch — both are glue, not kernel work.
    print("KERNEL_OK")
</pallas_src>

<mosaic_0001>
module attributes {stable_mosaic.version = 11 : i64} {
  func.func @mapnet_fused_kernel(%arg0: i32, %arg1: memref<128x128xf32, #tpu.memory_space<vmem>>, %arg2: memref<4x128x128xbf16, #tpu.memory_space<vmem>>, %arg3: memref<24x128x128xbf16, #tpu.memory_space<vmem>>, %arg4: memref<4x128x128xbf16, #tpu.memory_space<vmem>>, %arg5: memref<4x1x128xf32, #tpu.memory_space<vmem>>, %arg6: memref<4x1x128xf32, #tpu.memory_space<vmem>>, %arg7: memref<4x1x128xf32, #tpu.memory_space<vmem>>, %arg8: memref<4x1x128xf32, #tpu.memory_space<vmem>>, %arg9: memref<6x128x128xbf16, #tpu.memory_space<vmem>>, %arg10: memref<128x128xf32, #tpu.memory_space<vmem>>, %arg11: memref<128x128xf32, #tpu.memory_space<vmem>>) attributes {dimension_semantics = [#tpu.dimension_semantics<arbitrary>], iteration_bounds = array<i64: 1>, scalar_prefetch = 0 : i64, scratch_operands = 1 : i64, tpu.core_type = #tpu.core_type<tc>, window_params = [{pipeline_mode = #tpu.pipeline_mode<synchronous>, transform_indices = @transform_0, window_bounds = array<i64: 128, 128>}, {pipeline_mode = #tpu.pipeline_mode<synchronous>, transform_indices = @transform_1, window_bounds = array<i64: 4, 128, 128>}, {pipeline_mode = #tpu.pipeline_mode<synchronous>, transform_indices = @transform_2, window_bounds = array<i64: 24, 128, 128>}, {pipeline_mode = #tpu.pipeline_mode<synchronous>, transform_indices = @transform_3, window_bounds = array<i64: 4, 128, 128>}, {pipeline_mode = #tpu.pipeline_mode<synchronous>, transform_indices = @transform_4, window_bounds = array<i64: 4, 1, 128>}, {pipeline_mode = #tpu.pipeline_mode<synchronous>, transform_indices = @transform_5, window_bounds = array<i64: 4, 1, 128>}, {pipeline_mode = #tpu.pipeline_mode<synchronous>, transform_indices = @transform_6, window_bounds = array<i64: 4, 1, 128>}, {pipeline_mode = #tpu.pipeline_mode<synchronous>, transform_indices = @transform_7, window_bounds = array<i64: 4, 1, 128>}, {pipeline_mode = #tpu.pipeline_mode<synchronous>, transform_indices = @transform_8, window_bounds = array<i64: 6, 128, 128>}, {pipeline_mode = #tpu.pipeline_mode<synchronous>, transform_indices = @transform_9, window_bounds = array<i64: 128, 128>}]} {
    %c0 = arith.constant 0 : index
    %c0_0 = arith.constant 0 : index
    %0 = vector.load %arg1[%c0, %c0_0] : memref<128x128xf32, #tpu.memory_space<vmem>>, vector<128x128xf32>
    %c0_1 = arith.constant 0 : index
    %c0_2 = arith.constant 0 : index
    %1 = vector.load %arg11[%c0_1, %c0_2] : memref<128x128xf32, #tpu.memory_space<vmem>>, vector<128x128xf32>
    tpu.vector_store %arg11[%c0_1, %c0_2], %0 {strides = array<i32>} : memref<128x128xf32, #tpu.memory_space<vmem>>, vector<128x128xf32>,
    %c0_i32 = arith.constant 0 : i32
    %c4_i32 = arith.constant 4 : i32
    %2 = arith.addi %c0_i32, %c4_i32 : i32
    %c1_i32 = arith.constant 1 : i32
    scf.for %arg12 = %c0_i32 to %2 step %c1_i32  : i32 {
      %c0_8 = arith.constant 0 : index
      %c0_9 = arith.constant 0 : index
      %5 = vector.load %arg11[%c0_8, %c0_9] : memref<128x128xf32, #tpu.memory_space<vmem>>, vector<128x128xf32>
      %6 = arith.truncf %5 : vector<128x128xf32> to vector<128x128xbf16>
      %7 = arith.index_cast %arg12 : i32 to index
      %c0_10 = arith.constant 0 : index
      %c0_11 = arith.constant 0 : index
      %8 = vector.load %arg2[%7, %c0_10, %c0_11] : memref<4x128x128xbf16, #tpu.memory_space<vmem>>, vector<1x128x128xbf16>
      %9 = vector.shape_cast %8 : vector<1x128x128xbf16> to vector<128x128xbf16>
      %cst = arith.constant dense<0.000000e+00> : vector<128x128xf32>
      %10 = tpu.matmul %6, %9, %cst {dimension_numbers = #tpu.dot_dimension_numbers<[1], [0], [0], [1], [0, 0, 1, 1], [], []>} : vector<128x128xbf16>, vector<128x128xbf16>, vector<128x128xf32> -> vector<128x128xf32>
      %c6_i32 = arith.constant 6 : i32
      %11 = arith.muli %arg12, %c6_i32 : i32
      %c0_i32_12 = arith.constant 0 : i32
      %12 = arith.addi %11, %c0_i32_12 : i32
      %13 = arith.index_cast %12 : i32 to index
      %c0_13 = arith.constant 0 : index
      %c0_14 = arith.constant 0 : index
      %14 = vector.load %arg3[%13, %c0_13, %c0_14] : memref<24x128x128xbf16, #tpu.memory_space<vmem>>, vector<1x128x128xbf16>
      %15 = vector.shape_cast %14 : vector<1x128x128xbf16> to vector<128x128xbf16>
      %cst_15 = arith.constant dense<0.000000e+00> : vector<128x128xf32>
      %16 = tpu.matmul %6, %15, %cst_15 {dimension_numbers = #tpu.dot_dimension_numbers<[1], [0], [0], [1], [0, 0, 1, 1], [], []>} : vector<128x128xbf16>, vector<128x128xbf16>, vector<128x128xf32> -> vector<128x128xf32>
      %17 = arith.truncf %16 : vector<128x128xf32> to vector<128x128xbf16>
      %c0_16 = arith.constant 0 : index
      %c0_17 = arith.constant 0 : index
      %c0_18 = arith.constant 0 : index
      %18 = vector.load %arg9[%c0_16, %c0_17, %c0_18] : memref<6x128x128xbf16, #tpu.memory_space<vmem>>, vector<1x128x128xbf16>
      %19 = vector.shape_cast %18 : vector<1x128x128xbf16> to vector<128x128xbf16>
      %cst_19 = arith.constant dense<0.000000e+00> : vector<128x128xf32>
      %20 = tpu.matmul %19, %17, %cst_19 {dimension_numbers = #tpu.dot_dimension_numbers<[1], [0], [0], [1], [0, 0, 1, 1], [], []>} : vector<128x128xbf16>, vector<128x128xbf16>, vector<128x128xf32> -> vector<128x128xf32>
      %21 = arith.addf %10, %20 : vector<128x128xf32>
      %c6_i32_20 = arith.constant 6 : i32
      %22 = arith.muli %arg12, %c6_i32_20 : i32
      %c1_i32_21 = arith.constant 1 : i32
      %23 = arith.addi %22, %c1_i32_21 : i32
      %24 = arith.index_cast %23 : i32 to index
      %c0_22 = arith.constant 0 : index
      %c0_23 = arith.constant 0 : index
      %25 = vector.load %arg3[%24, %c0_22, %c0_23] : memref<24x128x128xbf16, #tpu.memory_space<vmem>>, vector<1x128x128xbf16>
      %26 = vector.shape_cast %25 : vector<1x128x128xbf16> to vector<128x128xbf16>
      %cst_24 = arith.constant dense<0.000000e+00> : vector<128x128xf32>
      %27 = tpu.matmul %6, %26, %cst_24 {dimension_numbers = #tpu.dot_dimension_numbers<[1], [0], [0], [1], [0, 0, 1, 1], [], []>} : vector<128x128xbf16>, vector<128x128xbf16>, vector<128x128xf32> -> vector<128x128xf32>
      %28 = arith.truncf %27 : vector<128x128xf32> to vector<128x128xbf16>
      %c1 = arith.constant 1 : index
      %c0_25 = arith.constant 0 : index
      %c0_26 = arith.constant 0 : index
      %29 = vector.load %arg9[%c1, %c0_25, %c0_26] : memref<6x128x128xbf16, #tpu.memory_space<vmem>>, vector<1x128x128xbf16>
      %30 = vector.shape_cast %29 : vector<1x128x128xbf16> to vector<128x128xbf16>
      %cst_27 = arith.constant dense<0.000000e+00> : vector<128x128xf32>
      %31 = tpu.matmul %30, %28, %cst_27 {dimension_numbers = #tpu.dot_dimension_numbers<[1], [0], [0], [1], [0, 0, 1, 1], [], []>} : vector<128x128xbf16>, vector<128x128xbf16>, vector<128x128xf32> -> vector<128x128xf32>
      %32 = arith.addf %21, %31 : vector<128x128xf32>
      %c6_i32_28 = arith.constant 6 : i32
      %33 = arith.muli %arg12, %c6_i32_28 : i32
      %c2_i32 = arith.constant 2 : i32
      %34 = arith.addi %33, %c2_i32 : i32
      %35 = arith.index_cast %34 : i32 to index
      %c0_29 = arith.constant 0 : index
      %c0_30 = arith.constant 0 : index
      %36 = vector.load %arg3[%35, %c0_29, %c0_30] : memref<24x128x128xbf16, #tpu.memory_space<vmem>>, vector<1x128x128xbf16>
      %37 = vector.shape_cast %36 : vector<1x128x128xbf16> to vector<128x128xbf16>
      %cst_31 = arith.constant dense<0.000000e+00> : vector<128x128xf32>
      %38 = tpu.matmul %6, %37, %cst_31 {dimension_numbers = #tpu.dot_dimension_numbers<[1], [0], [0], [1], [0, 0, 1, 1], [], []>} : vector<128x128xbf16>, vector<128x128xbf16>, vector<128x128xf32> -> vector<128x128xf32>
      %39 = arith.truncf %38 : vector<128x128xf32> to vector<128x128xbf16>
      %c2 = arith.constant 2 : index
      %c0_32 = arith.constant 0 : index
      %c0_33 = arith.constant 0 : index
      %40 = vector.load %arg9[%c2, %c0_32, %c0_33] : memref<6x128x128xbf16, #tpu.memory_space<vmem>>, vector<1x128x128xbf16>
      %41 = vector.shape_cast %40 : vector<1x128x128xbf16> to vector<128x128xbf16>
      %cst_34 = arith.constant dense<0.000000e+00> : vector<128x128xf32>
      %42 = tpu.matmul %41, %39, %cst_34 {dimension_numbers = #tpu.dot_dimension_numbers<[1], [0], [0], [1], [0, 0, 1, 1], [], []>} : vector<128x128xbf16>, vector<128x128xbf16>, vector<128x128xf32> -> vector<128x128xf32>
      %43 = arith.addf %32, %42 : vector<128x128xf32>
      %c6_i32_35 = arith.constant 6 : i32
      %44 = arith.muli %arg12, %c6_i32_35 : i32
      %c3_i32 = arith.constant 3 : i32
      %45 = arith.addi %44, %c3_i32 : i32
      %46 = arith.index_cast %45 : i32 to index
      %c0_36 = arith.constant 0 : index
      %c0_37 = arith.constant 0 : index
      %47 = vector.load %arg3[%46, %c0_36, %c0_37] : memref<24x128x128xbf16, #tpu.memory_space<vmem>>, vector<1x128x128xbf16>
      %48 = vector.shape_cast %47 : vector<1x128x128xbf16> to vector<128x128xbf16>
      %cst_38 = arith.constant dense<0.000000e+00> : vector<128x128xf32>
      %49 = tpu.matmul %6, %48, %cst_38 {dimension_numbers = #tpu.dot_dimension_numbers<[1], [0], [0], [1], [0, 0, 1, 1], [], []>} : vector<128x128xbf16>, vector<128x128xbf16>, vector<128x128xf32> -> vector<128x128xf32>
      %50 = arith.truncf %49 : vector<128x128xf32> to vector<128x128xbf16>
      %c3 = arith.constant 3 : index
      %c0_39 = arith.constant 0 : index
      %c0_40 = arith.constant 0 : index
      %51 = vector.load %arg9[%c3, %c0_39, %c0_40] : memref<6x128x128xbf16, #tpu.memory_space<vmem>>, vector<1x128x128xbf16>
      %52 = vector.shape_cast %51 : vector<1x128x128xbf16> to vector<128x128xbf16>
      %cst_41 = arith.constant dense<0.000000e+00> : vector<128x128xf32>
      %53 = tpu.matmul %52, %50, %cst_41 {dimension_numbers = #tpu.dot_dimension_numbers<[1], [0], [0], [1], [0, 0, 1, 1], [], []>} : vector<128x128xbf16>, vector<128x128xbf16>, vector<128x128xf32> -> vector<128x128xf32>
      %54 = arith.addf %43, %53 : vector<128x128xf32>
      %c6_i32_42 = arith.constant 6 : i32
      %55 = arith.muli %arg12, %c6_i32_42 : i32
      %c4_i32_43 = arith.constant 4 : i32
      %56 = arith.addi %55, %c4_i32_43 : i32
      %57 = arith.index_cast %56 : i32 to index
      %c0_44 = arith.constant 0 : index
      %c0_45 = arith.constant 0 : index
      %58 = vector.load %arg3[%57, %c0_44, %c0_45] : memref<24x128x128xbf16, #tpu.memory_space<vmem>>, vector<1x128x128xbf16>
      %59 = vector.shape_cast %58 : vector<1x128x128xbf16> to vector<128x128xbf16>
      %cst_46 = arith.constant dense<0.000000e+00> : vector<128x128xf32>
      %60 = tpu.matmul %6, %59, %cst_46 {dimension_numbers = #tpu.dot_dimension_numbers<[1], [0], [0], [1], [0, 0, 1, 1], [], []>} : vector<128x128xbf16>, vector<128x128xbf16>, vector<128x128xf32> -> vector<128x128xf32>
      %61 = arith.truncf %60 : vector<128x128xf32> to vector<128x128xbf16>
      %c4 = arith.constant 4 : index
      %c0_47 = arith.constant 0 : index
      %c0_48 = arith.constant 0 : index
      %62 = vector.load %arg9[%c4, %c0_47, %c0_48] : memref<6x128x128xbf16, #tpu.memory_space<vmem>>, vector<1x128x128xbf16>
      %63 = vector.shape_cast %62 : vector<1x128x128xbf16> to vector<128x128xbf16>
      %cst_49 = arith.constant dense<0.000000e+00> : vector<128x128xf32>
      %64 = tpu.matmul %63, %61, %cst_49 {dimension_numbers = #tpu.dot_dimension_numbers<[1], [0], [0], [1], [0, 0, 1, 1], [], []>} : vector<128x128xbf16>, vector<128x128xbf16>, vector<128x128xf32> -> vector<128x128xf32>
      %65 = arith.addf %54, %64 : vector<128x128xf32>
      %c6_i32_50 = arith.constant 6 : i32
      %66 = arith.muli %arg12, %c6_i32_50 : i32
      %c5_i32 = arith.constant 5 : i32
      %67 = arith.addi %66, %c5_i32 : i32
      %68 = arith.index_cast %67 : i32 to index
      %c0_51 = arith.constant 0 : index
      %c0_52 = arith.constant 0 : index
      %69 = vector.load %arg3[%68, %c0_51, %c0_52] : memref<24x128x128xbf16, #tpu.memory_space<vmem>>, vector<1x128x128xbf16>
      %70 = vector.shape_cast %69 : vector<1x128x128xbf16> to vector<128x128xbf16>
      %cst_53 = arith.constant dense<0.000000e+00> : vector<128x128xf32>
      %71 = tpu.matmul %6, %70, %cst_53 {dimension_numbers = #tpu.dot_dimension_numbers<[1], [0], [0], [1], [0, 0, 1, 1], [], []>} : vector<128x128xbf16>, vector<128x128xbf16>, vector<128x128xf32> -> vector<128x128xf32>
      %72 = arith.truncf %71 : vector<128x128xf32> to vector<128x128xbf16>
      %c5 = arith.constant 5 : index
      %c0_54 = arith.constant 0 : index
      %c0_55 = arith.constant 0 : index
      %73 = vector.load %arg9[%c5, %c0_54, %c0_55] : memref<6x128x128xbf16, #tpu.memory_space<vmem>>, vector<1x128x128xbf16>
      %74 = vector.shape_cast %73 : vector<1x128x128xbf16> to vector<128x128xbf16>
      %cst_56 = arith.constant dense<0.000000e+00> : vector<128x128xf32>
      %75 = tpu.matmul %74, %72, %cst_56 {dimension_numbers = #tpu.dot_dimension_numbers<[1], [0], [0], [1], [0, 0, 1, 1], [], []>} : vector<128x128xbf16>, vector<128x128xbf16>, vector<128x128xf32> -> vector<128x128xf32>
      %76 = arith.addf %65, %75 : vector<128x128xf32>
      %77 = arith.index_cast %arg12 : i32 to index
      %c0_57 = arith.constant 0 : index
      %c0_58 = arith.constant 0 : index
      %78 = vector.load %arg5[%77, %c0_57, %c0_58] : memref<4x1x128xf32, #tpu.memory_space<vmem>>, vector<1x1x128xf32>
      %79 = vector.shape_cast %78 : vector<1x1x128xf32> to vector<1x128xf32>
      %80 = arith.index_cast %arg12 : i32 to index
      %c0_59 = arith.constant 0 : index
      %c0_60 = arith.constant 0 : index
      %81 = vector.load %arg6[%80, %c0_59, %c0_60] : memref<4x1x128xf32, #tpu.memory_space<vmem>>, vector<1x1x128xf32>
      %82 = vector.shape_cast %81 : vector<1x1x128xf32> to vector<1x128xf32>
      %cst_61 = arith.constant dense<0.000000e+00> : vector<128xf32>
      %83 = vector.multi_reduction <add>, %76, %cst_61 [1] : vector<128x128xf32> to vector<128xf32>
      %84 = vector.shape_cast %83 : vector<128xf32> to vector<128x1xf32>
      %cst_62 = arith.constant 1.280000e+02 : f32
      %85 = vector.broadcast %cst_62 : f32 to vector<128x1xf32>
      %86 = arith.divf %84, %85 : vector<128x1xf32>
      %87 = vector.broadcast %86 : vector<128x1xf32> to vector<128x128xf32>
      %88 = arith.subf %76, %87 : vector<128x128xf32>
      %89 = arith.mulf %88, %88 : vector<128x128xf32>
      %cst_63 = arith.constant dense<0.000000e+00> : vector<128xf32>
      %90 = vector.multi_reduction <add>, %89, %cst_63 [1] : vector<128x128xf32> to vector<128xf32>
      %91 = vector.shape_cast %90 : vector<128xf32> to vector<128x1xf32>
      %cst_64 = arith.constant 1.280000e+02 : f32
      %92 = vector.broadcast %cst_64 : f32 to vector<128x1xf32>
      %93 = arith.divf %91, %92 : vector<128x1xf32>
      %94 = vector.broadcast %86 : vector<128x1xf32> to vector<128x128xf32>
      %95 = arith.subf %76, %94 : vector<128x128xf32>
      %cst_65 = arith.constant 9.99999974E-6 : f32
      %96 = vector.broadcast %cst_65 : f32 to vector<128x1xf32>
      %97 = arith.addf %93, %96 : vector<128x1xf32>
      %98 = math.rsqrt %97 : vector<128x1xf32>
      %99 = vector.broadcast %98 : vector<128x1xf32> to vector<128x128xf32>
      %100 = arith.mulf %95, %99 : vector<128x128xf32>
      %101 = vector.broadcast %79 : vector<1x128xf32> to vector<128x128xf32>
      %102 = arith.mulf %100, %101 : vector<128x128xf32>
      %103 = vector.broadcast %82 : vector<1x128xf32> to vector<128x128xf32>
      %104 = arith.addf %102, %103 : vector<128x128xf32>
      %cst_66 = arith.constant 0.000000e+00 : f32
      %105 = vector.broadcast %cst_66 : f32 to vector<128x128xf32>
      %106 = arith.maximumf %104, %105 : vector<128x128xf32>
      %107 = arith.truncf %106 : vector<128x128xf32> to vector<128x128xbf16>
      %108 = arith.index_cast %arg12 : i32 to index
      %c0_67 = arith.constant 0 : index
      %c0_68 = arith.constant 0 : index
      %109 = vector.load %arg4[%108, %c0_67, %c0_68] : memref<4x128x128xbf16, #tpu.memory_space<vmem>>, vector<1x128x128xbf16>
      %110 = vector.shape_cast %109 : vector<1x128x128xbf16> to vector<128x128xbf16>
      %cst_69 = arith.constant dense<0.000000e+00> : vector<128x128xf32>
      %111 = tpu.matmul %107, %110, %cst_69 {dimension_numbers = #tpu.dot_dimension_numbers<[1], [0], [0], [1], [0, 0, 1, 1], [], []>} : vector<128x128xbf16>, vector<128x128xbf16>, vector<128x128xf32> -> vector<128x128xf32>
      %112 = arith.index_cast %arg12 : i32 to index
      %c0_70 = arith.constant 0 : index
      %c0_71 = arith.constant 0 : index
      %113 = vector.load %arg7[%112, %c0_70, %c0_71] : memref<4x1x128xf32, #tpu.memory_space<vmem>>, vector<1x1x128xf32>
      %114 = vector.shape_cast %113 : vector<1x1x128xf32> to vector<1x128xf32>
      %115 = arith.index_cast %arg12 : i32 to index
      %c0_72 = arith.constant 0 : index
      %c0_73 = arith.constant 0 : index
      %116 = vector.load %arg8[%115, %c0_72, %c0_73] : memref<4x1x128xf32, #tpu.memory_space<vmem>>, vector<1x1x128xf32>
      %117 = vector.shape_cast %116 : vector<1x1x128xf32> to vector<1x128xf32>
      %cst_74 = arith.constant dense<0.000000e+00> : vector<128xf32>
      %118 = vector.multi_reduction <add>, %111, %cst_74 [1] : vector<128x128xf32> to vector<128xf32>
      %119 = vector.shape_cast %118 : vector<128xf32> to vector<128x1xf32>
      %cst_75 = arith.constant 1.280000e+02 : f32
      %120 = vector.broadcast %cst_75 : f32 to vector<128x1xf32>
      %121 = arith.divf %119, %120 : vector<128x1xf32>
      %122 = vector.broadcast %121 : vector<128x1xf32> to vector<128x128xf32>
      %123 = arith.subf %111, %122 : vector<128x128xf32>
      %124 = arith.mulf %123, %123 : vector<128x128xf32>
      %cst_76 = arith.constant dense<0.000000e+00> : vector<128xf32>
      %125 = vector.multi_reduction <add>, %124, %cst_76 [1] : vector<128x128xf32> to vector<128xf32>
      %126 = vector.shape_cast %125 : vector<128xf32> to vector<128x1xf32>
      %cst_77 = arith.constant 1.280000e+02 : f32
      %127 = vector.broadcast %cst_77 : f32 to vector<128x1xf32>
      %128 = arith.divf %126, %127 : vector<128x1xf32>
      %129 = vector.broadcast %121 : vector<128x1xf32> to vector<128x128xf32>
      %130 = arith.subf %111, %129 : vector<128x128xf32>
      %cst_78 = arith.constant 9.99999974E-6 : f32
      %131 = vector.broadcast %cst_78 : f32 to vector<128x1xf32>
      %132 = arith.addf %128, %131 : vector<128x1xf32>
      %133 = math.rsqrt %132 : vector<128x1xf32>
      %134 = vector.broadcast %133 : vector<128x1xf32> to vector<128x128xf32>
      %135 = arith.mulf %130, %134 : vector<128x128xf32>
      %136 = vector.broadcast %114 : vector<1x128xf32> to vector<128x128xf32>
      %137 = arith.mulf %135, %136 : vector<128x128xf32>
      %138 = vector.broadcast %117 : vector<1x128xf32> to vector<128x128xf32>
      %139 = arith.addf %137, %138 : vector<128x128xf32>
      %140 = arith.addf %139, %5 : vector<128x128xf32>
      %cst_79 = arith.constant 0.000000e+00 : f32
      %141 = vector.broadcast %cst_79 : f32 to vector<128x128xf32>
      %142 = arith.maximumf %140, %141 : vector<128x128xf32>
      %c0_80 = arith.constant 0 : index
      %c0_81 = arith.constant 0 : index
      %143 = vector.load %arg11[%c0_80, %c0_81] : memref<128x128xf32, #tpu.memory_space<vmem>>, vector<128x128xf32>
      tpu.vector_store %arg11[%c0_80, %c0_81], %142 {strides = array<i32>} : memref<128x128xf32, #tpu.memory_space<vmem>>, vector<128x128xf32>,
    }
    %c4_i32_3 = arith.constant 4 : i32
    %c0_4 = arith.constant 0 : index
    %c0_5 = arith.constant 0 : index
    %3 = vector.load %arg11[%c0_4, %c0_5] : memref<128x128xf32, #tpu.memory_space<vmem>>, vector<128x128xf32>
    %c0_6 = arith.constant 0 : index
    %c0_7 = arith.constant 0 : index
    %4 = vector.load %arg10[%c0_6, %c0_7] : memref<128x128xf32, #tpu.memory_space<vmem>>, vector<128x128xf32>
    tpu.vector_store %arg10[%c0_6, %c0_7], %3 {strides = array<i32>} : memref<128x128xf32, #tpu.memory_space<vmem>>, vector<128x128xf32>,
    return
  }
  func.func @transform_0(%arg0: i32) -> (i32, i32) {
    %c0_i32 = arith.constant 0 : i32
    %c0_i32_0 = arith.constant 0 : i32
    %c0_i32_1 = arith.constant 0 : i32
    return %c0_i32, %c0_i32_0 : i32, i32
  }
  func.func @transform_1(%arg0: i32) -> (i32, i32, i32) {
    %c0_i32 = arith.constant 0 : i32
    %c0_i32_0 = arith.constant 0 : i32
    %c0_i32_1 = arith.constant 0 : i32
    %c0_i32_2 = arith.constant 0 : i32
    return %c0_i32, %c0_i32_0, %c0_i32_1 : i32, i32, i32
  }
  func.func @transform_2(%arg0: i32) -> (i32, i32, i32) {
    %c0_i32 = arith.constant 0 : i32
    %c0_i32_0 = arith.constant 0 : i32
    %c0_i32_1 = arith.constant 0 : i32
    %c0_i32_2 = arith.constant 0 : i32
    return %c0_i32, %c0_i32_0, %c0_i32_1 : i32, i32, i32
  }
  func.func @transform_3(%arg0: i32) -> (i32, i32, i32) {
    %c0_i32 = arith.constant 0 : i32
    %c0_i32_0 = arith.constant 0 : i32
    %c0_i32_1 = arith.constant 0 : i32
    %c0_i32_2 = arith.constant 0 : i32
    return %c0_i32, %c0_i32_0, %c0_i32_1 : i32, i32, i32
  }
  func.func @transform_4(%arg0: i32) -> (i32, i32, i32) {
    %c0_i32 = arith.constant 0 : i32
    %c0_i32_0 = arith.constant 0 : i32
    %c0_i32_1 = arith.constant 0 : i32
    %c0_i32_2 = arith.constant 0 : i32
    return %c0_i32, %c0_i32_0, %c0_i32_1 : i32, i32, i32
  }
  func.func @transform_5(%arg0: i32) -> (i32, i32, i32) {
    %c0_i32 = arith.constant 0 : i32
    %c0_i32_0 = arith.constant 0 : i32
    %c0_i32_1 = arith.constant 0 : i32
    %c0_i32_2 = arith.constant 0 : i32
    return %c0_i32, %c0_i32_0, %c0_i32_1 : i32, i32, i32
  }
  func.func @transform_6(%arg0: i32) -> (i32, i32, i32) {
    %c0_i32 = arith.constant 0 : i32
    %c0_i32_0 = arith.constant 0 : i32
    %c0_i32_1 = arith.constant 0 : i32
    %c0_i32_2 = arith.constant 0 : i32
    return %c0_i32, %c0_i32_0, %c0_i32_1 : i32, i32, i32
  }
  func.func @transform_7(%arg0: i32) -> (i32, i32, i32) {
    %c0_i32 = arith.constant 0 : i32
    %c0_i32_0 = arith.constant 0 : i32
    %c0_i32_1 = arith.constant 0 : i32
    %c0_i32_2 = arith.constant 0 : i32
    return %c0_i32, %c0_i32_0, %c0_i32_1 : i32, i32, i32
  }
  func.func @transform_8(%arg0: i32) -> (i32, i32, i32) {
    %c0_i32 = arith.constant 0 : i32
    %c0_i32_0 = arith.constant 0 : i32
    %c0_i32_1 = arith.constant 0 : i32
    %c0_i32_2 = arith.constant 0 : i32
    return %c0_i32, %c0_i32_0, %c0_i32_1 : i32, i32, i32
  }
  func.func @transform_9(%arg0: i32) -> (i32, i32) {
    %c0_i32 = arith.constant 0 : i32
    %c0_i32_0 = arith.constant 0 : i32
    %c0_i32_1 = arith.constant 0 : i32
    return %c0_i32, %c0_i32_0 : i32, i32
  }
}

</mosaic_0001>

<bundles_post_ra>
// kernel: tpu_custom_call.1
= control target key start
LH: loop header
LB: loop body
LE: loop exit
PB: predicated region body
PF: predicated region fallthrough
CT: control target
= control target key end

     0   :  { %14 = vsyncpa [#allocation4], 0  ;;  %s5176_s0 = inlined_call_operand.hbm [shape: f32[128,128], index: 0, kind: input, shape index: {}]   ;;  %s5177_s1 = inlined_call_operand.hbm [shape: bf16[4,128,128], index: 1, kind: input, shape index: {}]   ;;  %s5178_s2 = inlined_call_operand.hbm [shape: bf16[24,128,128], index: 2, kind: input, shape index: {}]   ;;  %s5179_s3 = inlined_call_operand.hbm [shape: bf16[4,128,128], index: 3, kind: input, shape index: {}]   ;;  %s5180_s4 = inlined_call_operand.vmem [shape: f32[4,1,128], index: 4, kind: input, shape index: {}]   ;;  %s5181_s5 = inlined_call_operand.vmem [shape: f32[4,1,128], index: 5, kind: input, shape index: {}]   ;;  %s5182_s6 = inlined_call_operand.vmem [shape: f32[4,1,128], index: 6, kind: input, shape index: {}]   ;;  %s5183_s7 = inlined_call_operand.vmem [shape: f32[4,1,128], index: 7, kind: input, shape index: {}]   ;;  %s5184_s8 = inlined_call_operand.hbm [shape: bf16[6,128,128], index: 8, kind: input, shape index: {}]   ;;  %s5185_s9 = inlined_call_operand.hbm [shape: f32[128,128], index: 9, kind: output, shape index: {}]  }
   0x1   :  { %15 = vsyncpa [#allocation7], 0 }
   0x2   :  { %16 = vsyncpa [#allocation10], 0 }
   0x3   :  { %17 = vsyncpa [#allocation5], 0  ;;  %s4522_s30 = smov [#allocation6]   ;;  %s4374_s13 = scalar_lea.hbm %s5177_s1, 4096 }
   0x4   :  { %s35_s10 = sshll.u32 %s4522_s30, 4  ;;  %p4375_p0 = scmp.ne.s32.totalorder %s5177_s1, %s4374_s13  ;;  %s36_s10 = int_to_ptr.vmem [resolvable:$true] %s35_s10 }
   0x5   :  { %p4378_p1 = scmp.lt.u32.totalorder %s4374_s13, %s5177_s1 }
   0x7   :  { %p4380_p2 = pnand %p4378_p1, %p4375_p0 }
   0x9   :  { %4383 = shalt.err (!%p4380_p2)
}
   0xa   :  { %s4384_s18 = scalar_lea.vmem %s36_s10, 4096  ;;  %p4389_p4 = scmp.lt.s32.totalorder %s36_s10, %s36_s10 }
   0xb   :  { %p4385_p3 = scmp.ne.s32.totalorder %s36_s10, %s4384_s18  ;;  %p4390_p5 = scmp.lt.s32.totalorder %s4384_s18, %s4384_s18 }
   0xd   :  { %p4391_p6 = por %p4390_p5, %p4389_p4 }
   0xf   :  { %p4392_p7 = pnand %p4391_p6, %p4385_p3 }
  0x11   :  { %4395 = shalt.err (!%p4392_p7)
}
  0x12   :  { %s4523_s19 = smov 64   ;;  %s4524_s20 = smov 4  }
  0x13   :  { %41 = dma.hbm_to_vmem [thread:$0]  %s5177_s1, 4096, %s36_s10, [#allocation7], %s4523_s19, %s4523_s19, %s4524_s20  }
  0x14   :  { %s4525_s23 = smov [#allocation9]   ;;  %s4526_s25 = smov [#allocation3]  }
  0x15   :  { %s59_s24 = sshll.u32 %s4525_s23, 4  ;;  %s23_s26 = sshll.u32 %s4526_s25, 4  ;;  %s60_s24 = int_to_ptr.vmem [resolvable:$true] %s59_s24  ;;  %s24_s26 = int_to_ptr.vmem [resolvable:$true] %s23_s26 }
  0x16   :  { %s4396_s29 = scalar_lea.hbm %s5179_s3, 4096 }
  0x17   :  { %p4397_p8 = scmp.ne.s32.totalorder %s5179_s3, %s4396_s29  ;;  %p4400_p9 = scmp.lt.u32.totalorder %s4396_s29, %s5179_s3 }
  0x19   :  { %p4402_p10 = pnand %p4400_p9, %p4397_p8 }
  0x1b   :  { %4405 = shalt.err (!%p4402_p10)
}
  0x1c   :  { %s4406_s1 = scalar_lea.vmem %s60_s24, 4096  ;;  %p4411_p12 = scmp.lt.s32.totalorder %s60_s24, %s60_s24 }
  0x1d   :  { %p4407_p11 = scmp.ne.s32.totalorder %s60_s24, %s4406_s1  ;;  %p4412_p13 = scmp.lt.s32.totalorder %s4406_s1, %s4406_s1 }
  0x1f   :  { %p4413_p0 = por %p4412_p13, %p4411_p12 }
  0x21   :  { %p4414_p1 = pnand %p4413_p0, %p4407_p11 }
  0x23   :  { %4417 = shalt.err (!%p4414_p1)
}
  0x24   :  { %65 = dma.hbm_to_vmem [thread:$0]  %s5179_s3, 4096, %s60_s24, [#allocation10], %s4523_s19, %s4523_s19, %s4524_s20  }
  0x25   :  { %s4418_s17 = scalar_lea.hbm %s5176_s0, 2048 }
  0x26   :  { %p4419_p2 = scmp.ne.s32.totalorder %s5176_s0, %s4418_s17  ;;  %p4422_p3 = scmp.lt.u32.totalorder %s4418_s17, %s5176_s0 }
  0x28   :  { %p4424_p4 = pnand %p4422_p3, %p4419_p2 }
  0x2a   :  { %4427 = shalt.err (!%p4424_p4)
}
  0x2b   :  { %s4428_s25 = scalar_lea.vmem %s24_s26, 2048  ;;  %p4433_p6 = scmp.lt.s32.totalorder %s24_s26, %s24_s26 }
  0x2c   :  { %p4429_p5 = scmp.ne.s32.totalorder %s24_s26, %s4428_s25  ;;  %p4434_p7 = scmp.lt.s32.totalorder %s4428_s25, %s4428_s25 }
  0x2e   :  { %p4435_p8 = por %p4434_p7, %p4433_p6 }
  0x30   :  { %p4436_p9 = pnand %p4435_p8, %p4429_p5 }
  0x32   :  { %4439 = shalt.err (!%p4436_p9)
}
  0x33   :  { %s4527_s3 = smov 128   ;;  %s4528_s24 = smov 8  }
  0x34   :  { %29 = dma.hbm_to_vmem [thread:$0]  %s5176_s0, 2048, %s24_s26, [#allocation4], %s4527_s3, %s4527_s3, %s4528_s24  }
  0x35   :  { %s4529_s29 = smov [#allocation8]   ;;  %s4530_s11 = smov [#allocation11]  }
  0x36   :  { %s47_s30 = sshll.u32 %s4529_s29, 4  ;;  %s79_s12 = sshll.u32 %s4530_s11, 4  ;;  %s48_s30 = int_to_ptr.vmem [resolvable:$true] %s47_s30  ;;  %s80_s12 = int_to_ptr.vmem [resolvable:$true] %s79_s12 }
  0x37   :  { %s4440_s10 = scalar_lea.hbm %s5178_s2, 24576 }
  0x38   :  { %p4441_p10 = scmp.ne.s32.totalorder %s5178_s2, %s4440_s10  ;;  %p4444_p11 = scmp.lt.u32.totalorder %s4440_s10, %s5178_s2 }
  0x3a   :  { %p4446_p12 = pnand %p4444_p11, %p4441_p10 }
  0x3c   :  { %4449 = shalt.err (!%p4446_p12)
}
  0x3d   :  { %s4450_s0 = scalar_lea.vmem %s48_s30, 24576  ;;  %p4455_p0 = scmp.lt.s32.totalorder %s48_s30, %s48_s30 }
  0x3e   :  { %p4451_p13 = scmp.ne.s32.totalorder %s48_s30, %s4450_s0  ;;  %p4456_p1 = scmp.lt.s32.totalorder %s4450_s0, %s4450_s0 }
  0x40   :  { %p4457_p2 = por %p4456_p1, %p4455_p0 }
  0x42   :  { %p4458_p3 = pnand %p4457_p2, %p4451_p13 }
  0x44   :  { %4461 = shalt.err (!%p4458_p3)
}
  0x45   :  { %53 = dma.hbm_to_vmem [thread:$0]  %s5178_s2, 24576, %s48_s30, [#allocation7], %s4523_s19, %s4523_s19, %s4524_s20  }
  0x46   :  { %s4462_s23 = scalar_lea.hbm %s5184_s8, 6144 }
  0x47   :  { %p4463_p4 = scmp.ne.s32.totalorder %s5184_s8, %s4462_s23  ;;  %p4466_p5 = scmp.lt.u32.totalorder %s4462_s23, %s5184_s8 }
  0x49   :  { %p4468_p6 = pnand %p4466_p5, %p4463_p4 }
  0x4b   :  { %4471 = shalt.err (!%p4468_p6)
}
  0x4c   :  { %s4472_s11 = scalar_lea.vmem %s80_s12, 6144  ;;  %p4477_p8 = scmp.lt.s32.totalorder %s80_s12, %s80_s12 }
  0x4d   :  { %p4473_p7 = scmp.ne.s32.totalorder %s80_s12, %s4472_s11  ;;  %p4478_p9 = scmp.lt.s32.totalorder %s4472_s11, %s4472_s11 }
  0x4f   :  { %p4479_p10 = por %p4478_p9, %p4477_p8 }
  0x51   :  { %p4480_p11 = pnand %p4479_p10, %p4473_p7 }
  0x53   :  { %4483 = shalt.err (!%p4480_p11)
}
  0x54   :  { %85 = dma.hbm_to_vmem [thread:$0]  %s5184_s8, 6144, %s80_s12, [#allocation10], %s4523_s19, %s4523_s19, %s4524_s20  }
  0x55   :  { %4510 = dma.done.wait [#allocation4], 2048  }
  0x56   :  { %4511 = vsyncadd [#allocation4], 4294965248 }
  0x57   :  { %4512 = dma.done.wait [#allocation7], 28672  }
  0x58   :  { %4513 = vsyncadd [#allocation7], 4294938624 }
  0x59   :  { %4514 = dma.done.wait [#allocation10], 10240  }
  0x5a   :  { %4515 = vsyncadd [#allocation10], 4294957056  ;;  %v102_v0 = vld [vmem:[#allocation3] sm:$0xff]  ;;  %v103_v1 = vld [vmem:[#allocation3 + $0x8] sm:$0xff]  ;;  %s4657_s8 = smov 0  }
  0x5b   :  { %v104_v2 = vld [vmem:[#allocation3 + $0x10] sm:$0xff]  ;;  %118 = vst [vmem:[#allocation2] sm:$0xff] %v102_v0  ;;  %119 = vst [vmem:[#allocation2 + $0x8] sm:$0xff] %v103_v1  ;;  %v105_v3 = vld [vmem:[#allocation3 + $0x18] sm:$0xff] }
  0x5c   :  { %120 = vst [vmem:[#allocation2 + $0x10] sm:$0xff] %v104_v2  ;;  %v106_v4 = vld [vmem:[#allocation3 + $0x20] sm:$0xff]  ;;  %v107_v5 = vld [vmem:[#allocation3 + $0x28] sm:$0xff]  ;;  %121 = vst [vmem:[#allocation2 + $0x18] sm:$0xff] %v105_v3 }
  0x5d   :  { %122 = vst [vmem:[#allocation2 + $0x20] sm:$0xff] %v106_v4  ;;  %123 = vst [vmem:[#allocation2 + $0x28] sm:$0xff] %v107_v5  ;;  %v108_v6 = vld [vmem:[#allocation3 + $0x30] sm:$0xff]  ;;  %v109_v7 = vld [vmem:[#allocation3 + $0x38] sm:$0xff] }
  0x5e   :  { %v110_v8 = vld [vmem:[#allocation3 + $0x40] sm:$0xff]  ;;  %124 = vst [vmem:[#allocation2 + $0x30] sm:$0xff] %v108_v6  ;;  %125 = vst [vmem:[#allocation2 + $0x38] sm:$0xff] %v109_v7  ;;  %v111_v9 = vld [vmem:[#allocation3 + $0x48] sm:$0xff] }
  0x5f   :  { %126 = vst [vmem:[#allocation2 + $0x40] sm:$0xff] %v110_v8  ;;  %v112_v10 = vld [vmem:[#allocation3 + $0x50] sm:$0xff]  ;;  %v113_v11 = vld [vmem:[#allocation3 + $0x58] sm:$0xff]  ;;  %127 = vst [vmem:[#allocation2 + $0x48] sm:$0xff] %v111_v9 }
  0x60   :  { %128 = vst [vmem:[#allocation2 + $0x50] sm:$0xff] %v112_v10  ;;  %129 = vst [vmem:[#allocation2 + $0x58] sm:$0xff] %v113_v11  ;;  %v114_v12 = vld [vmem:[#allocation3 + $0x60] sm:$0xff]  ;;  %v115_v13 = vld [vmem:[#allocation3 + $0x68] sm:$0xff] }
  0x61   :  { %v116_v14 = vld [vmem:[#allocation3 + $0x70] sm:$0xff]  ;;  %130 = vst [vmem:[#allocation2 + $0x60] sm:$0xff] %v114_v12  ;;  %131 = vst [vmem:[#allocation2 + $0x68] sm:$0xff] %v115_v13  ;;  %v117_v15 = vld [vmem:[#allocation3 + $0x78] sm:$0xff] }
  0x62   :  { %132 = vst [vmem:[#allocation2 + $0x70] sm:$0xff] %v116_v14  ;;  %133 = vst [vmem:[#allocation2 + $0x78] sm:$0xff] %v117_v15 }
  0x63 LB: > { %v140_v16 = vld [vmem:[#allocation2] sm:$0xff]  ;;  %v141_v17 = vld [vmem:[#allocation2 + $0x8] sm:$0xff]  ;;  %s3394_s19 = smul.u32 384, %s4520_s8  ;;  %v142_v27 = vld [vmem:[#allocation2 + $0x10] sm:$0xff]  ;;  %s3393_s12 = sshll.u32 %s4520_s8, 6  ;;  %s4520_s8 = sphi %s4657_s8, %s139_s8  }
  0x64   : > { %v4662_v18 = vpack.c.bf16 %v141_v17, %v140_v16  ;;  %v143_v28 = vld [vmem:[#allocation2 + $0x18] sm:$0xff]  ;;  %v144_v29 = vld [vmem:[#allocation2 + $0x20] sm:$0xff]  ;;  %v145_v30 = vld [vmem:[#allocation2 + $0x28] sm:$0xff]  ;;  %s4755_s13 = scalar_lea.vmem [#allocation6], %s3393_s12  ;;  %s4902_s1 = scalar_lea.vmem [#allocation9], %s3393_s12 }
  0x65   : > { %s4666_s20 = scalar_lea.vmem [#allocation8], %s3394_s19  ;;  %v4677_v32 = vpack.c.bf16 %v143_v28, %v142_v27  ;;  %v4679_v33 = vpack.c.bf16 %v145_v30, %v144_v29  ;;  %v146_v35 = vld [vmem:[#allocation2 + $0x30] sm:$0xff]  ;;  %v147_v36 = vld [vmem:[#allocation2 + $0x38] sm:$0xff]  ;;  %v4230_v16 = vld [vmem:[#allocation11] sm:$0xff]   ;;  %s2417_s15 = scalar_lea.vmem %s5180_s4, %s4520_s8 }
  0x66   : > { %3636 = vmatprep.mubr.bf16.mxu0 %v4662_v18  ;;  %v4182_v19 = vld [vmem:[%s4666_s20] sm:$0xff]   ;;  %v4183_v20 = vld [vmem:[%s4666_s20 + $0x8] sm:$0xff]   ;;  %v4184_v21 = vld [vmem:[%s4666_s20 + $0x10] sm:$0xff]   ;;  %v4685_v40 = vpack.c.bf16 %v147_v36, %v146_v35  ;;  %3668 = vmatprep.mubr.bf16.mxu1 %v4230_v16  ;;  %s2419_s0 = scalar_lea.vmem %s5181_s5, %s4520_s8  ;;  %s2829_s21 = scalar_lea.vmem %s5182_s6, %s4520_s8 }
  0x67   : > { %3620 = vmatprep.subr.bf16.mxu0 %v4182_v19  ;;  %v4185_v22 = vld [vmem:[%s4666_s20 + $0x18] sm:$0xff]   ;;  %v4186_v23 = vld [vmem:[%s4666_s20 + $0x20] sm:$0xff]   ;;  %v4187_v24 = vld [vmem:[%s4666_s20 + $0x28] sm:$0xff]   ;;  %s2831_s25 = scalar_lea.vmem %s5183_s7, %s4520_s8  ;;  %s139_s8 = sadd.s32 1, %s4520_s8  }
  0x68   : > { %3621 = vmatpush3.bf16.msra.mxu0 %v4182_v19  ;;  %v4188_v25 = vld [vmem:[%s4666_s20 + $0x30] sm:$0xff]   ;;  %v4189_v26 = vld [vmem:[%s4666_s20 + $0x38] sm:$0xff]   ;;  %v4190_v31 = vld [vmem:[%s4666_s20 + $0x40] sm:$0xff]   ;;  %p136_p12 = scmp.ge.s32.totalorder %s139_s8, 4  }
  0x69   : > { %3622 = vmatprep.subr.bf16.mxu0 %v4183_v20  ;;  %v4191_v34 = vld [vmem:[%s4666_s20 + $0x48] sm:$0xff]   ;;  %v148_v37 = vld [vmem:[#allocation2 + $0x40] sm:$0xff]  ;;  %v4192_v39 = vld [vmem:[%s4666_s20 + $0x50] sm:$0xff]   ;;  %s4531_s27 = smov (%p136_p12), [#allocation12]  }
  0x6a   : > { %v149_v38 = vld [vmem:[#allocation2 + $0x48] sm:$0xff]  ;;  %v4193_v42 = vld [vmem:[%s4666_s20 + $0x58] sm:$0xff]   ;;  %v150_v43 = vld [vmem:[#allocation2 + $0x50] sm:$0xff]  ;;  %s3138_s28 = sshll.u32 (%p136_p12), %s4531_s27, 4  ;;  %s3139_s28 = int_to_ptr.vmem [resolvable:$true] %s3138_s28 }
  0x6b   : > { %v4687_v41 = vpack.c.bf16 %v149_v38, %v148_v37  ;;  %v151_v44 = vld [vmem:[#allocation2 + $0x58] sm:$0xff]  ;;  %v152_v45 = vld [vmem:[#allocation2 + $0x60] sm:$0xff]  ;;  %v153_v46 = vld [vmem:[#allocation2 + $0x68] sm:$0xff]  ;;  %s4484_s4 = scalar_lea.vmem (%p136_p12), %s3139_s28, 2048  ;;  %p4489_p0 = scmp.lt.s32.totalorder (%p136_p12), %s3139_s28, %s3139_s28 }
  0x6c   : > { %3623 = vmatpush3.bf16.msra.mxu0 %v4183_v20  ;;  %v4194_v47 = vld [vmem:[%s4666_s20 + $0x60] sm:$0xff]   ;;  %v4693_v48 = vpack.c.bf16 %v151_v44, %v150_v43  ;;  %v4195_v49 = vld [vmem:[%s4666_s20 + $0x68] sm:$0xff]   ;;  %v4696_v50 = vpack.c.bf16 %v153_v46, %v152_v45  ;;  %v154_v51 = vld [vmem:[#allocation2 + $0x70] sm:$0xff]  ;;  %p4485_p13 = scmp.ne.s32.totalorder (%p136_p12), %s3139_s28, %s4484_s4  ;;  %p4490_p1 = scmp.lt.s32.totalorder (%p136_p12), %s4484_s4, %s4484_s4 }
  0x6d   : > { %3624 = vmatprep.subr.bf16.mxu0 %v4184_v21  ;;  %v155_v52 = vld [vmem:[#allocation2 + $0x78] sm:$0xff]  ;;  %v4196_v53 = vld [vmem:[%s4666_s20 + $0x70] sm:$0xff]   ;;  %v4198_v56 = vld [vmem:[%s4666_s20 + $0x80] sm:$0xff]  }
  0x6e   : > { %v4701_v54 = vpack.c.bf16 %v155_v52, %v154_v51  ;;  %v4197_v55 = vld [vmem:[%s4666_s20 + $0x78] sm:$0xff]   ;;  %v4199_v57 = vld [vmem:[%s4666_s20 + $0x88] sm:$0xff]   ;;  %v4200_v58 = vld [vmem:[%s4666_s20 + $0x90] sm:$0xff]   ;;  %p4491_p2 = por (%p136_p12), %p4490_p1, %p4489_p0 }
  0x6f   : > { %v4201_v59 = vld [vmem:[%s4666_s20 + $0x98] sm:$0xff]   ;;  %v4202_v60 = vld [vmem:[%s4666_s20 + $0xa0] sm:$0xff]   ;;  %v4203_v61 = vld [vmem:[%s4666_s20 + $0xa8] sm:$0xff]  }
  0x70   : > { %3625 = vmatpush3.bf16.msra.mxu0 %v4184_v21  ;;  %v4204_v62 = vld [vmem:[%s4666_s20 + $0xb0] sm:$0xff]   ;;  %v4205_v63 = vld [vmem:[%s4666_s20 + $0xb8] sm:$0xff]   ;;  %v4206_v0 = vld [vmem:[%s4666_s20 + $0xc0] sm:$0xff]   ;;  %p4492_p3 = pnand (%p136_p12), %p4491_p2, %p4485_p13 }
  0x71   : > { %3626 = vmatprep.subr.bf16.mxu0 %v4185_v22  ;;  %v4207_v1 = vld [vmem:[%s4666_s20 + $0xc8] sm:$0xff]   ;;  %v4208_v2 = vld [vmem:[%s4666_s20 + $0xd0] sm:$0xff]   ;;  %v4209_v3 = vld [vmem:[%s4666_s20 + $0xd8] sm:$0xff]  }
  0x72   : > { %v4210_v4 = vld [vmem:[%s4666_s20 + $0xe0] sm:$0xff]   ;;  %v4211_v5 = vld [vmem:[%s4666_s20 + $0xe8] sm:$0xff]   ;;  %v4212_v6 = vld [vmem:[%s4666_s20 + $0xf0] sm:$0xff]  }
  0x73   : > { %v4213_v7 = vld [vmem:[%s4666_s20 + $0xf8] sm:$0xff]   ;;  %v4214_v8 = vld [vmem:[%s4666_s20 + $0x100] sm:$0xff]   ;;  %v4215_v9 = vld [vmem:[%s4666_s20 + $0x108] sm:$0xff]  }
  0x74   : > { %3627 = vmatpush3.bf16.msra.mxu0 %v4185_v22  ;;  %v4216_v10 = vld [vmem:[%s4666_s20 + $0x110] sm:$0xff]   ;;  %v4217_v11 = vld [vmem:[%s4666_s20 + $0x118] sm:$0xff]   ;;  %v4218_v12 = vld [vmem:[%s4666_s20 + $0x120] sm:$0xff]  }
  0x75   : > { %3628 = vmatprep.subr.bf16.mxu0 %v4186_v23  ;;  %v4219_v13 = vld [vmem:[%s4666_s20 + $0x128] sm:$0xff]   ;;  %v4220_v14 = vld [vmem:[%s4666_s20 + $0x130] sm:$0xff]   ;;  %v4221_v15 = vld [vmem:[%s4666_s20 + $0x138] sm:$0xff]  }
  0x76   : > { %v4222_v17 = vld [vmem:[%s4666_s20 + $0x140] sm:$0xff]   ;;  %v4223_v19 = vld [vmem:[%s4666_s20 + $0x148] sm:$0xff]   ;;  %v4224_v20 = vld [vmem:[%s4666_s20 + $0x150] sm:$0xff]  }
  0x77   : > { %v4225_v21 = vld [vmem:[%s4666_s20 + $0x158] sm:$0xff]   ;;  %v4226_v22 = vld [vmem:[%s4666_s20 + $0x160] sm:$0xff]   ;;  %v4239_v16 = vld [vmem:[#allocation11 + $0x28] sm:$0xff]  }
  0x78   : > { %3629 = vmatpush3.bf16.msra.mxu0 %v4186_v23  ;;  %v4227_v23 = vld [vmem:[%s4666_s20 + $0x168] sm:$0xff]  }
  0x79   : > { %3630 = vmatprep.subr.bf16.mxu0 %v4187_v24 }
  0x7c   : > { %3631 = vmatpush3.bf16.msra.mxu0 %v4187_v24  ;;  %v4228_v24 = vld [vmem:[%s4666_s20 + $0x170] sm:$0xff]  }
  0x7d   : > { %3632 = vmatprep.subr.bf16.mxu0 %v4188_v25 }
  0x80   : > { %3633 = vmatpush3.bf16.msra.mxu0 %v4188_v25  ;;  %v4229_v25 = vld [vmem:[%s4666_s20 + $0x178] sm:$0xff]  }
  0x81   : > { %3634 = vmatprep.subr.bf16.mxu0 %v4189_v26 }
  0x84   : > { %3635 = vmatpush3.bf16.msra.mxu0 %v4189_v26 }
  0x85   : > { %3716 = vmatprep.subr.bf16.mxu0 %v4190_v31 }
  0x87   : > { %3637 = vmatmul.mubr.bf16.vlgmr.msra.gmra.mrb[0].mxu0 %v4677_v32 }
  0x88   : > { %3640 = vmatprep.mubr.bf16.mxu0 %v4679_v33  ;;  %3717 = vmatpush3.bf16.msra.mxu0 %v4190_v31 }
  0x89   : > { %3718 = vmatprep.subr.bf16.mxu0 %v4191_v34 }
  0x8c   : > { %3719 = vmatpush3.bf16.msra.mxu0 %v4191_v34 }
  0x8d   : > { %3720 = vmatprep.subr.bf16.mxu0 %v4192_v39 }
  0x8f   : > { %3641 = vmatmul.mubr.bf16.gmra.mrb[4].mxu0 %v4685_v40 }
  0x90   : > { %3644 = vmatprep.mubr.bf16.mxu0 %v4687_v41  ;;  %3721 = vmatpush3.bf16.msra.mxu0 %v4192_v39 }
  0x91   : > { %3722 = vmatprep.subr.bf16.mxu0 %v4193_v42 }
  0x94   : > { %3723 = vmatpush3.bf16.msra.mxu0 %v4193_v42 }
  0x95   : > { %3724 = vmatprep.subr.bf16.mxu0 %v4194_v47 }
  0x97   : > { %3645 = vmatmul.mubr.bf16.gmra.mrb[8].mxu0 %v4693_v48 }
  0x98   : > { %3648 = vmatprep.mubr.bf16.mxu0 %v4696_v50  ;;  %3725 = vmatpush3.bf16.msra.mxu0 %v4194_v47 }
  0x99   : > { %3726 = vmatprep.subr.bf16.mxu0 %v4195_v49 }
  0x9c   : > { %3727 = vmatpush3.bf16.msra.mxu0 %v4195_v49 }
  0x9d   : > { %3728 = vmatprep.subr.bf16.mxu0 %v4196_v53 }
  0x9f   : > { %3649 = vmatmul.mubr.bf16.gmra.mrb[12].mxu0 %v4701_v54 }
  0xa0   : > { %3729 = vmatpush3.bf16.msra.mxu0 %v4196_v53  ;;  %3732 = vmatprep.mubr.bf16.mxu0 %v4662_v18 }
  0xa1   : > { %3730 = vmatprep.subr.bf16.mxu0 %v4197_v55 }
  0xa4   : > { %3731 = vmatpush3.bf16.msra.mxu0 %v4197_v55 }
  0xa5   : > { %3780 = vmatprep.subr.bf16.mxu0 %v4198_v56 }
  0xa7   : > { %3733 = vmatmul.mubr.bf16.vlgmr.msra.gmra.mrb[16].mxu0 %v4677_v32 }
  0xa8   : > { %3781 = vmatpush3.bf16.msra.mxu0 %v4198_v56  ;;  %3736 = vmatprep.mubr.bf16.mxu0 %v4679_v33 }
  0xa9   : > { %3782 = vmatprep.subr.bf16.mxu0 %v4199_v57 }
  0xac   : > { %3783 = vmatpush3.bf16.msra.mxu0 %v4199_v57  ;;  %v4232_v57 = vld [vmem:[%s4755_s13] sm:$0xff]  }
  0xad   : > { %3784 = vmatprep.subr.bf16.mxu0 %v4200_v58 }
  0xaf   : > { %3737 = vmatmul.mubr.bf16.gmra.mrb[20].mxu0 %v4685_v40 }
  0xb0   : > { %3785 = vmatpush3.bf16.msra.mxu0 %v4200_v58  ;;  %3740 = vmatprep.mubr.bf16.mxu0 %v4687_v41 }
  0xb1   : > { %3786 = vmatprep.subr.bf16.mxu0 %v4201_v59 }
  0xb4   : > { %3787 = vmatpush3.bf16.msra.mxu0 %v4201_v59 }
  0xb5   : > { %3788 = vmatprep.subr.bf16.mxu0 %v4202_v60 }
  0xb7   : > { %3741 = vmatmul.mubr.bf16.gmra.mrb[24].mxu0 %v4693_v48 }
  0xb8   : > { %3789 = vmatpush3.bf16.msra.mxu0 %v4202_v60  ;;  %3744 = vmatprep.mubr.bf16.mxu0 %v4696_v50  ;;  %v4231_v60 = vld [vmem:[#allocation11 + $0x8] sm:$0xff]  }
  0xb9   : > { %3790 = vmatprep.subr.bf16.mxu0 %v4203_v61 }
  0xbc   : > { %3791 = vmatpush3.bf16.msra.mxu0 %v4203_v61 }
  0xbd   : > { %3792 = vmatprep.subr.bf16.mxu0 %v4204_v62 }
  0xbf   : > { %3745 = vmatmul.mubr.bf16.gmra.mrb[28].mxu0 %v4701_v54 }
  0xc0   : > { %3793 = vmatpush3.bf16.msra.mxu0 %v4204_v62  ;;  %3796 = vmatprep.mubr.bf16.mxu0 %v4662_v18  ;;  %v4234_v62 = vld [vmem:[#allocation11 + $0x10] sm:$0xff]  }
  0xc1   : > { %3794 = vmatprep.subr.bf16.mxu0 %v4205_v63 }
  0xc4   : > { %3795 = vmatpush3.bf16.msra.mxu0 %v4205_v63 }
  0xc5   : > { %3844 = vmatprep.subr.bf16.mxu0 %v4206_v0 }
  0xc7   : > { %3797 = vmatmul.mubr.bf16.vlgmr.msra.gmra.mrb[32].mxu0 %v4677_v32 }
  0xc8   : > { %3845 = vmatpush3.bf16.msra.mxu0 %v4206_v0  ;;  %3800 = vmatprep.mubr.bf16.mxu0 %v4679_v33 }
  0xc9   : > { %3846 = vmatprep.subr.bf16.mxu0 %v4207_v1 }
  0xcc   : > { %3847 = vmatpush3.bf16.msra.mxu0 %v4207_v1  ;;  %v4233_v1 = vld [vmem:[%s4755_s13 + $0x8] sm:$0xff]  }
  0xcd   : > { %3848 = vmatprep.subr.bf16.mxu0 %v4208_v2 }
  0xcf   : > { %3801 = vmatmul.mubr.bf16.gmra.mrb[36].mxu0 %v4685_v40 }
  0xd0   : > { %3849 = vmatpush3.bf16.msra.mxu0 %v4208_v2  ;;  %3804 = vmatprep.mubr.bf16.mxu0 %v4687_v41 }
  0xd1   : > { %3850 = vmatprep.subr.bf16.mxu0 %v4209_v3 }
  0xd4   : > { %3851 = vmatpush3.bf16.msra.mxu0 %v4209_v3  ;;  %v4236_v3 = vld [vmem:[%s4755_s13 + $0x10] sm:$0xff]  }
  0xd5   : > { %3852 = vmatprep.subr.bf16.mxu0 %v4210_v4 }
  0xd7   : > { %3805 = vmatmul.mubr.bf16.gmra.mrb[40].mxu0 %v4693_v48 }
  0xd8   : > { %3853 = vmatpush3.bf16.msra.mxu0 %v4210_v4  ;;  %3808 = vmatprep.mubr.bf16.mxu0 %v4696_v50 }
  0xd9   : > { %3854 = vmatprep.subr.bf16.mxu0 %v4211_v5 }
  0xdc   : > { %3855 = vmatpush3.bf16.msra.mxu0 %v4211_v5 }
  0xdd   : > { %3856 = vmatprep.subr.bf16.mxu0 %v4212_v6 }
  0xdf   : > { %3809 = vmatmul.mubr.bf16.gmra.mrb[44].mxu0 %v4701_v54 }
  0xe0   : > { %3857 = vmatpush3.bf16.msra.mxu0 %v4212_v6  ;;  %3860 = vmatprep.mubr.bf16.mxu0 %v4662_v18  ;;  %v4235_v6 = vld [vmem:[#allocation11 + $0x18] sm:$0xff]  }
  0xe1   : > { %3858 = vmatprep.subr.bf16.mxu0 %v4213_v7 }
  0xe4   : > { %3859 = vmatpush3.bf16.msra.mxu0 %v4213_v7 }
  0xe5   : > { %3908 = vmatprep.subr.bf16.mxu0 %v4214_v8 }
  0xe7   : > { %3861 = vmatmul.mubr.bf16.vlgmr.msra.gmra.mrb[48].mxu0 %v4677_v32 }
  0xe8   : > { %3909 = vmatpush3.bf16.msra.mxu0 %v4214_v8  ;;  %3864 = vmatprep.mubr.bf16.mxu0 %v4679_v33  ;;  %v4238_v8 = vld [vmem:[#allocation11 + $0x20] sm:$0xff]  }
  0xe9   : > { %3910 = vmatprep.subr.bf16.mxu0 %v4215_v9 }
  0xec   : > { %3911 = vmatpush3.bf16.msra.mxu0 %v4215_v9 }
  0xed   : > { %3912 = vmatprep.subr.bf16.mxu0 %v4216_v10 }
  0xef   : > { %3865 = vmatmul.mubr.bf16.gmra.mrb[52].mxu0 %v4685_v40 }
  0xf0   : > { %3913 = vmatpush3.bf16.msra.mxu0 %v4216_v10  ;;  %3868 = vmatprep.mubr.bf16.mxu0 %v4687_v41 }
  0xf1   : > { %3914 = vmatprep.subr.bf16.mxu0 %v4217_v11 }
  0xf4   : > { %3915 = vmatpush3.bf16.msra.mxu0 %v4217_v11  ;;  %v4237_v11 = vld [vmem:[%s4755_s13 + $0x18] sm:$0xff]  }
  0xf5   : > { %3916 = vmatprep.subr.bf16.mxu0 %v4218_v12 }
  0xf7   : > { %3869 = vmatmul.mubr.bf16.gmra.mrb[56].mxu0 %v4693_v48 }
  0xf8   : > { %3917 = vmatpush3.bf16.msra.mxu0 %v4218_v12  ;;  %3872 = vmatprep.mubr.bf16.mxu0 %v4696_v50 }
  0xf9   : > { %3918 = vmatprep.subr.bf16.mxu0 %v4219_v13 }
  0xfc   : > { %3919 = vmatpush3.bf16.msra.mxu0 %v4219_v13  ;;  %v4240_v13 = vld [vmem:[%s4755_s13 + $0x20] sm:$0xff]  }
  0xfd   : > { %3920 = vmatprep.subr.bf16.mxu0 %v4220_v14 }
  0xff   : > { %3873 = vmatmul.mubr.bf16.gmra.mrb[60].mxu0 %v4701_v54 }
 0x100   : > { %3921 = vmatpush3.bf16.msra.mxu0 %v4220_v14  ;;  %3924 = vmatprep.mubr.bf16.mxu0 %v4662_v18 }
 0x101   : > { %3922 = vmatprep.subr.bf16.mxu0 %v4221_v15 }
 0x104   : > { %3923 = vmatpush3.bf16.msra.mxu0 %v4221_v15 }
 0x105   : > { %3972 = vmatprep.subr.bf16.mxu0 %v4222_v17 }
 0x107   : > { %3925 = vmatmul.mubr.bf16.vlgmr.msra.gmra.mrb[64].mxu0 %v4677_v32 }
 0x108   : > { %3973 = vmatpush3.bf16.msra.mxu0 %v4222_v17  ;;  %3928 = vmatprep.mubr.bf16.mxu0 %v4679_v33 }
 0x109   : > { %3974 = vmatprep.subr.bf16.mxu0 %v4223_v19 }
 0x10c   : > { %3975 = vmatpush3.bf16.msra.mxu0 %v4223_v19  ;;  %v4242_v19 = vld [vmem:[#allocation11 + $0x30] sm:$0xff]  }
 0x10d   : > { %3976 = vmatprep.subr.bf16.mxu0 %v4224_v20 }
 0x10f   : > { %3929 = vmatmul.mubr.bf16.gmra.mrb[68].mxu0 %v4685_v40 }
 0x110   : > { %3977 = vmatpush3.bf16.msra.mxu0 %v4224_v20  ;;  %3932 = vmatprep.mubr.bf16.mxu0 %v4687_v41 }
 0x111   : > { %3978 = vmatprep.subr.bf16.mxu0 %v4225_v21 }
 0x114   : > { %3979 = vmatpush3.bf16.msra.mxu0 %v4225_v21 }
 0x115   : > { %3980 = vmatprep.subr.bf16.mxu0 %v4226_v22 }
 0x117   : > { %3933 = vmatmul.mubr.bf16.gmra.mrb[72].mxu0 %v4693_v48 }
 0x118   : > { %3981 = vmatpush3.bf16.msra.mxu0 %v4226_v22  ;;  %3936 = vmatprep.mubr.bf16.mxu0 %v4696_v50  ;;  %v4241_v22 = vld [vmem:[%s4755_s13 + $0x28] sm:$0xff]  }
 0x119   : > { %3982 = vmatprep.subr.bf16.mxu0 %v4227_v23 }
 0x11c   : > { %3983 = vmatpush3.bf16.msra.mxu0 %v4227_v23 }
 0x11d   : > { %3984 = vmatprep.subr.bf16.mxu0 %v4228_v24 }
 0x11f   : > { %3937 = vmatmul.mubr.bf16.gmra.mrb[76].mxu0 %v4701_v54 }
 0x120   : > { %3985 = vmatpush3.bf16.msra.mxu0 %v4228_v24  ;;  %3988 = vmatprep.mubr.bf16.mxu0 %v4662_v18  ;;  %v4244_v24 = vld [vmem:[%s4755_s13 + $0x30] sm:$0xff]  }
 0x121   : > { %3986 = vmatprep.subr.bf16.mxu0 %v4229_v25 }
 0x124   : > { %3987 = vmatpush3.bf16.msra.mxu0 %v4229_v25 }
 0x127   : > { %3989 = vmatmul.mubr.bf16.vlgmr.msra.gmra.mrb[80].mxu0 %v4677_v32 }
 0x128   : > { %3992 = vmatprep.mubr.bf16.mxu0 %v4679_v33 }
 0x12f   : > { %3993 = vmatmul.mubr.bf16.gmra.mrb[84].mxu0 %v4685_v40 }
 0x130   : > { %3996 = vmatprep.mubr.bf16.mxu0 %v4687_v41 }
 0x137   : > { %3997 = vmatmul.mubr.bf16.gmra.mrb[88].mxu0 %v4693_v48 }
 0x138   : > { %4000 = vmatprep.mubr.bf16.mxu0 %v4696_v50 }
 0x13f   : > { %4001 = vmatmul.mubr.bf16.gmra.mrb[92].mxu0 %v4701_v54 }
 0x15a   : > { %v3638_v26 = vpop.f32.mrb[0].mxu0 }
 0x15b   : > { %v285_v27 = vpop.f32.mrb[1].mxu0 }
 0x15c   : > { %v3639_v28 = vpop.f32.mrb[2].mxu0 }
 0x15d   : > { %v349_v29 = vpack.c.bf16 %v3639_v28, %v3638_v26  ;;  %v288_v30 = vpop.f32.mrb[3].mxu0 }
 0x15e   : > { %v348_v31 = vpack.c.bf16 %v288_v30, %v285_v27  ;;  %v4243_v27 = vld [vmem:[#allocation11 + $0x38] sm:$0xff]  }
 0x160   : > { %3652 = vmatprep.subr.bf16.mxu1 %v348_v31 }
 0x161   : > { %3653 = vmatpush3.bf16.msra.mxu1 %v348_v31  ;;  %v4245_v31 = vld [vmem:[%s4755_s13 + $0x38] sm:$0xff]  }
 0x162   : > { %v3642_v34 = vpop.f32.mrb[4].mxu0  ;;  %3654 = vmatprep.subr.bf16.mxu1 %v349_v29 }
 0x163   : > { %v301_v35 = vpop.f32.mrb[5].mxu0 }
 0x164   : > { %v3643_v36 = vpop.f32.mrb[6].mxu0 }
 0x165   : > { %v351_v37 = vpack.c.bf16 %v3643_v36, %v3642_v34  ;;  %v304_v38 = vpop.f32.mrb[7].mxu0  ;;  %3655 = vmatpush3.bf16.msra.mxu1 %v349_v29 }
 0x166   : > { %v350_v39 = vpack.c.bf16 %v304_v38, %v301_v35 }
 0x168   : > { %3656 = vmatprep.subr.bf16.mxu1 %v350_v39 }
 0x169   : > { %3657 = vmatpush3.bf16.msra.mxu1 %v350_v39 }
 0x16a   : > { %v3646_v42 = vpop.f32.mrb[8].mxu0  ;;  %3658 = vmatprep.subr.bf16.mxu1 %v351_v37 }
 0x16b   : > { %v317_v43 = vpop.f32.mrb[9].mxu0 }
 0x16c   : > { %v3647_v44 = vpop.f32.mrb[10].mxu0 }
 0x16d   : > { %v353_v45 = vpack.c.bf16 %v3647_v44, %v3646_v42  ;;  %v320_v46 = vpop.f32.mrb[11].mxu0  ;;  %3659 = vmatpush3.bf16.msra.mxu1 %v351_v37 }
 0x16e   : > { %v352_v47 = vpack.c.bf16 %v320_v46, %v317_v43 }
 0x170   : > { %3660 = vmatprep.subr.bf16.mxu1 %v352_v47 }
 0x171   : > { %3661 = vmatpush3.bf16.msra.mxu1 %v352_v47 }
 0x172   : > { %v3650_v49 = vpop.f32.mrb[12].mxu0  ;;  %3662 = vmatprep.subr.bf16.mxu1 %v353_v45 }
 0x173   : > { %v333_v51 = vpop.f32.mrb[13].mxu0 }
 0x174   : > { %v3651_v52 = vpop.f32.mrb[14].mxu0 }
 0x175   : > { %v355_v53 = vpack.c.bf16 %v3651_v52, %v3650_v49  ;;  %v336_v55 = vpop.f32.mrb[15].mxu0  ;;  %3663 = vmatpush3.bf16.msra.mxu1 %v353_v45 }
 0x176   : > { %v354_v56 = vpack.c.bf16 %v336_v55, %v333_v51 }
 0x178   : > { %3664 = vmatprep.subr.bf16.mxu1 %v354_v56 }
 0x179   : > { %3665 = vmatpush3.bf16.msra.mxu1 %v354_v56  ;;  %v4246_v56 = vld [vmem:[#allocation11 + $0x40] sm:$0xff]  }
 0x17a   : > { %3666 = vmatprep.subr.bf16.mxu1 %v355_v53  ;;  %v3734_v58 = vpop.f32.mrb[16].mxu0 }
 0x17b   : > { %v764_v59 = vpop.f32.mrb[17].mxu0 }
 0x17c   : > { %v3735_v61 = vpop.f32.mrb[18].mxu0 }
 0x17d   : > { %3667 = vmatpush3.bf16.msra.mxu1 %v355_v53  ;;  %v4783_v63 = vpack.c.bf16 %v3735_v61, %v3734_v58  ;;  %v767_v0 = vpop.f32.mrb[19].mxu0  ;;  %v4247_v61 = vld [vmem:[#allocation11 + $0x48] sm:$0xff]  }
 0x17e   : > { %3684 = vmatprep.subr.bf16.mxu1 %v4232_v57  ;;  %v827_v2 = vpack.c.bf16 %v767_v0, %v764_v59 }
 0x180   : > { %3669 = vmatmul.mubr.bf16.vlgmr.msra.gmra.mrb[0].mxu1 %v4231_v60 }
 0x181   : > { %3685 = vmatpush3.bf16.msra.mxu1 %v4232_v57  ;;  %3672 = vmatprep.mubr.bf16.mxu1 %v4234_v62  ;;  %v4248_v62 = vld [vmem:[#allocation11 + $0x50] sm:$0xff]  }
 0x182   : > { %3686 = vmatprep.subr.bf16.mxu1 %v4233_v1  ;;  %v3738_v4 = vpop.f32.mrb[20].mxu0 }
 0x183   : > { %v780_v5 = vpop.f32.mrb[21].mxu0 }
 0x184   : > { %v3739_v7 = vpop.f32.mrb[22].mxu0 }
 0x185   : > { %3687 = vmatpush3.bf16.msra.mxu1 %v4233_v1  ;;  %v4787_v9 = vpack.c.bf16 %v3739_v7, %v3738_v4  ;;  %v783_v10 = vpop.f32.mrb[23].mxu0 }
 0x186   : > { %3688 = vmatprep.subr.bf16.mxu1 %v4236_v3  ;;  %v829_v12 = vpack.c.bf16 %v783_v10, %v780_v5  ;;  %v4250_v5 = vld [vmem:[#allocation11 + $0x60] sm:$0xff]  }
 0x188   : > { %3673 = vmatmul.mubr.bf16.gmra.mrb[4].mxu1 %v4235_v6 }
 0x189   : > { %3689 = vmatpush3.bf16.msra.mxu1 %v4236_v3  ;;  %3676 = vmatprep.mubr.bf16.mxu1 %v4238_v8  ;;  %v4249_v3 = vld [vmem:[#allocation11 + $0x58] sm:$0xff]  }
 0x18a   : > { %3690 = vmatprep.subr.bf16.mxu1 %v4237_v11  ;;  %v3742_v14 = vpop.f32.mrb[24].mxu0 }
 0x18b   : > { %v796_v15 = vpop.f32.mrb[25].mxu0 }
 0x18c   : > { %v3743_v17 = vpop.f32.mrb[26].mxu0 }
 0x18d   : > { %3691 = vmatpush3.bf16.msra.mxu1 %v4237_v11  ;;  %v832_v20 = vpack.c.bf16 %v3743_v17, %v3742_v14  ;;  %v799_v21 = vpop.f32.mrb[27].mxu0  ;;  %v4251_v11 = vld [vmem:[#allocation11 + $0x68] sm:$0xff]  }
 0x18e   : > { %3692 = vmatprep.subr.bf16.mxu1 %v4240_v13  ;;  %v831_v23 = vpack.c.bf16 %v799_v21, %v796_v15 }
 0x190   : > { %3677 = vmatmul.mubr.bf16.gmra.mrb[8].mxu1 %v4239_v16 }
 0x191   : > { %3693 = vmatpush3.bf16.msra.mxu1 %v4240_v13  ;;  %3680 = vmatprep.mubr.bf16.mxu1 %v4242_v19  ;;  %v4252_v13 = vld [vmem:[#allocation11 + $0x70] sm:$0xff]  }
 0x192   : > { %3694 = vmatprep.subr.bf16.mxu1 %v4241_v22  ;;  %v3746_v25 = vpop.f32.mrb[28].mxu0 }
 0x193   : > { %v812_v26 = vpop.f32.mrb[29].mxu0 }
 0x194   : > { %v3747_v28 = vpop.f32.mrb[30].mxu0 }
 0x195   : > { %3695 = vmatpush3.bf16.msra.mxu1 %v4241_v22  ;;  %v834_v29 = vpack.c.bf16 %v3747_v28, %v3746_v25  ;;  %v815_v30 = vpop.f32.mrb[31].mxu0  ;;  %v4254_v22 = vld [vmem:[#allocation11 + $0x80] sm:$0xff]   ;;  %v4255_v28 = vld [vmem:[#allocation11 + $0x88] sm:$0xff]  }
 0x196   : > { %3696 = vmatprep.subr.bf16.mxu1 %v4244_v24  ;;  %v833_v34 = vpack.c.bf16 %v815_v30, %v812_v26  ;;  %v4256_v30 = vld [vmem:[#allocation11 + $0x90] sm:$0xff]  }
 0x198   : > { %3681 = vmatmul.mubr.bf16.gmra.mrb[12].mxu1 %v4243_v27 }
 0x199   : > { %3697 = vmatpush3.bf16.msra.mxu1 %v4244_v24  ;;  %3700 = vmatprep.mubr.bf16.mxu1 %v4662_v18 }
 0x19a   : > { %3698 = vmatprep.subr.bf16.mxu1 %v4245_v31  ;;  %v3798_v35 = vpop.f32.mrb[32].mxu0 }
 0x19b   : > { %v1115_v36 = vpop.f32.mrb[33].mxu0 }
 0x19c   : > { %v3799_v37 = vpop.f32.mrb[34].mxu0 }
 0x19d   : > { %3699 = vmatpush3.bf16.msra.mxu1 %v4245_v31  ;;  %v1179_v38 = vpack.c.bf16 %v3799_v37, %v3798_v35  ;;  %v1118_v39 = vpop.f32.mrb[35].mxu0 }
 0x19e   : > { %3748 = vmatprep.subr.bf16.mxu1 %v827_v2  ;;  %v1178_v42 = vpack.c.bf16 %v1118_v39, %v1115_v36 }
 0x1a0   : > { %3701 = vmatmul.mubr.bf16.vlgmr.msra.gmra.mrb[0].mxu1 %v4677_v32 }
 0x1a1   : > { %3749 = vmatpush3.bf16.msra.mxu1 %v827_v2  ;;  %3704 = vmatprep.mubr.bf16.mxu1 %v4679_v33 }
 0x1a2   : > { %3750 = vmatprep.subr.bf16.mxu1 %v4783_v63  ;;  %v3802_v43 = vpop.f32.mrb[36].mxu0 }
 0x1a3   : > { %v1131_v44 = vpop.f32.mrb[37].mxu0 }
 0x1a4   : > { %v3803_v45 = vpop.f32.mrb[38].mxu0 }
 0x1a5   : > { %3751 = vmatpush3.bf16.msra.mxu1 %v4783_v63  ;;  %v4799_v18 = vpack.c.bf16 %v3803_v45, %v3802_v43  ;;  %v1134_v46 = vpop.f32.mrb[39].mxu0 }
 0x1a6   : > { %3752 = vmatprep.subr.bf16.mxu1 %v829_v12  ;;  %v1180_v47 = vpack.c.bf16 %v1134_v46, %v1131_v44 }
 0x1a8   : > { %3705 = vmatmul.mubr.bf16.gmra.mrb[4].mxu1 %v4685_v40 }
 0x1a9   : > { %3753 = vmatpush3.bf16.msra.mxu1 %v829_v12  ;;  %3708 = vmatprep.mubr.bf16.mxu1 %v4687_v41 }
 0x1aa   : > { %3754 = vmatprep.subr.bf16.mxu1 %v4787_v9  ;;  %v3806_v32 = vpop.f32.mrb[40].mxu0 }
 0x1ab   : > { %v1147_v33 = vpop.f32.mrb[41].mxu0 }
 0x1ac   : > { %v3807_v49 = vpop.f32.mrb[42].mxu0 }
 0x1ad   : > { %3755 = vmatpush3.bf16.msra.mxu1 %v4787_v9  ;;  %v4805_v51 = vpack.c.bf16 %v3807_v49, %v3806_v32  ;;  %v1150_v52 = vpop.f32.mrb[43].mxu0 }
 0x1ae   : > { %3756 = vmatprep.subr.bf16.mxu1 %v831_v23  ;;  %v1182_v53 = vpack.c.bf16 %v1150_v52, %v1147_v33  ;;  %v4260_v33 = vld [vmem:[#allocation11 + $0xb0] sm:$0xff]  }
 0x1b0   : > { %3709 = vmatmul.mubr.bf16.gmra.mrb[8].mxu1 %v4693_v48 }
 0x1b1   : > { %3757 = vmatpush3.bf16.msra.mxu1 %v831_v23  ;;  %3712 = vmatprep.mubr.bf16.mxu1 %v4696_v50 }
 0x1b2   : > { %3758 = vmatprep.subr.bf16.mxu1 %v832_v20  ;;  %v3810_v40 = vpop.f32.mrb[44].mxu0 }
 0x1b3   : > { %v1163_v41 = vpop.f32.mrb[45].mxu0 }
 0x1b4   : > { %v3811_v55 = vpop.f32.mrb[46].mxu0 }
 0x1b5   : > { %3759 = vmatpush3.bf16.msra.mxu1 %v832_v20  ;;  %v4809_v57 = vpack.c.bf16 %v3811_v55, %v3810_v40  ;;  %v1166_v58 = vpop.f32.mrb[47].mxu0  ;;  %v4253_v20 = vld [vmem:[#allocation11 + $0x78] sm:$0xff]  }
 0x1b6   : > { %3760 = vmatprep.subr.bf16.mxu1 %v833_v34  ;;  %v1184_v59 = vpack.c.bf16 %v1166_v58, %v1163_v41  ;;  %v4261_v41 = vld [vmem:[#allocation11 + $0xb8] sm:$0xff]  }
 0x1b8   : > { %3713 = vmatmul.mubr.bf16.gmra.mrb[12].mxu1 %v4701_v54 }
 0x1b9   : > { %3761 = vmatpush3.bf16.msra.mxu1 %v833_v34  ;;  %3764 = vmatprep.mubr.bf16.mxu1 %v4246_v56  ;;  %v4262_v56 = vld [vmem:[#allocation11 + $0xc0] sm:$0xff]  }
 0x1ba   : > { %3762 = vmatprep.subr.bf16.mxu1 %v834_v29  ;;  %v3862_v48 = vpop.f32.mrb[48].mxu0 }
 0x1bb   : > { %v1466_v60 = vpop.f32.mrb[49].mxu0 }
 0x1bc   : > { %v3863_v50 = vpop.f32.mrb[50].mxu0 }
 0x1bd   : > { %3763 = vmatpush3.bf16.msra.mxu1 %v834_v29  ;;  %v4812_v63 = vpack.c.bf16 %v3863_v50, %v3862_v48  ;;  %v1469_v0 = vpop.f32.mrb[51].mxu0 }
 0x1be   : > { %3812 = vmatprep.subr.bf16.mxu1 %v1178_v42  ;;  %v1529_v1 = vpack.c.bf16 %v1469_v0, %v1466_v60 }
 0x1c0   : > { %3765 = vmatmul.mubr.bf16.vlgmr.msra.gmra.mrb[0].mxu1 %v4247_v61  ;;  %v4263_v61 = vld [vmem:[#allocation11 + $0xc8] sm:$0xff]  }
 0x1c1   : > { %3813 = vmatpush3.bf16.msra.mxu1 %v1178_v42  ;;  %3768 = vmatprep.mubr.bf16.mxu1 %v4248_v62  ;;  %v4258_v42 = vld [vmem:[#allocation11 + $0xa0] sm:$0xff]   ;;  %v4264_v62 = vld [vmem:[#allocation11 + $0xd0] sm:$0xff]  }
 0x1c2   : > { %3814 = vmatprep.subr.bf16.mxu1 %v1179_v38  ;;  %v3866_v2 = vpop.f32.mrb[52].mxu0 }
 0x1c3   : > { %v1482_v54 = vpop.f32.mrb[53].mxu0 }
 0x1c4   : > { %v3867_v4 = vpop.f32.mrb[54].mxu0 }
 0x1c5   : > { %3815 = vmatpush3.bf16.msra.mxu1 %v1179_v38  ;;  %v4814_v6 = vpack.c.bf16 %v3867_v4, %v3866_v2  ;;  %v1485_v7 = vpop.f32.mrb[55].mxu0  ;;  %v4257_v38 = vld [vmem:[#allocation11 + $0x98] sm:$0xff]  }
 0x1c6   : > { %3816 = vmatprep.subr.bf16.mxu1 %v1180_v47  ;;  %v1531_v8 = vpack.c.bf16 %v1485_v7, %v1482_v54 }
 0x1c8   : > { %3769 = vmatmul.mubr.bf16.gmra.mrb[4].mxu1 %v4249_v3  ;;  %v4265_v3 = vld [vmem:[#allocation11 + $0xd8] sm:$0xff]  }
 0x1c9   : > { %3817 = vmatpush3.bf16.msra.mxu1 %v1180_v47  ;;  %3772 = vmatprep.mubr.bf16.mxu1 %v4250_v5  ;;  %v4259_v47 = vld [vmem:[#allocation11 + $0xa8] sm:$0xff]   ;;  %v4266_v5 = vld [vmem:[#allocation11 + $0xe0] sm:$0xff]  }
 0x1ca   : > { %3818 = vmatprep.subr.bf16.mxu1 %v4799_v18  ;;  %v3870_v9 = vpop.f32.mrb[56].mxu0 }
 0x1cb   : > { %v1498_v10 = vpop.f32.mrb[57].mxu0 }
 0x1cc   : > { %v3871_v12 = vpop.f32.mrb[58].mxu0 }
 0x1cd   : > { %3819 = vmatpush3.bf16.msra.mxu1 %v4799_v18  ;;  %v4818_v14 = vpack.c.bf16 %v3871_v12, %v3870_v9  ;;  %v1501_v15 = vpop.f32.mrb[59].mxu0 }
 0x1ce   : > { %3820 = vmatprep.subr.bf16.mxu1 %v1182_v53  ;;  %v1533_v16 = vpack.c.bf16 %v1501_v15, %v1498_v10 }
 0x1d0   : > { %3773 = vmatmul.mubr.bf16.gmra.mrb[8].mxu1 %v4251_v11  ;;  %v4267_v11 = vld [vmem:[#allocation11 + $0xe8] sm:$0xff]  }
 0x1d1   : > { %3821 = vmatpush3.bf16.msra.mxu1 %v1182_v53  ;;  %3776 = vmatprep.mubr.bf16.mxu1 %v4252_v13  ;;  %v4268_v13 = vld [vmem:[#allocation11 + $0xf0] sm:$0xff]  }
 0x1d2   : > { %3822 = vmatprep.subr.bf16.mxu1 %v4805_v51  ;;  %v3874_v17 = vpop.f32.mrb[60].mxu0 }
 0x1d3   : > { %v1514_v19 = vpop.f32.mrb[61].mxu0 }
 0x1d4   : > { %v3875_v21 = vpop.f32.mrb[62].mxu0 }
 0x1d5   : > { %3823 = vmatpush3.bf16.msra.mxu1 %v4805_v51  ;;  %v4822_v23 = vpack.c.bf16 %v3875_v21, %v3874_v17  ;;  %v1517_v24 = vpop.f32.mrb[63].mxu0 }
 0x1d6   : > { %3824 = vmatprep.subr.bf16.mxu1 %v1184_v59  ;;  %v1535_v25 = vpack.c.bf16 %v1517_v24, %v1514_v19 }
 0x1d8   : > { %3777 = vmatmul.mubr.bf16.gmra.mrb[12].mxu1 %v4253_v20  ;;  %v4269_v20 = vld [vmem:[#allocation11 + $0xf8] sm:$0xff]  }
 0x1d9   : > { %3825 = vmatpush3.bf16.msra.mxu1 %v1184_v59  ;;  %3828 = vmatprep.mubr.bf16.mxu1 %v4254_v22  ;;  %v4270_v22 = vld [vmem:[#allocation11 + $0x100] sm:$0xff]  }
 0x1da   : > { %3826 = vmatprep.subr.bf16.mxu1 %v4809_v57  ;;  %v3926_v26 = vpop.f32.mrb[64].mxu0 }
 0x1db   : > { %v1817_v27 = vpop.f32.mrb[65].mxu0 }
 0x1dc   : > { %v3927_v29 = vpop.f32.mrb[66].mxu0 }
 0x1dd   : > { %3827 = vmatpush3.bf16.msra.mxu1 %v4809_v57  ;;  %v4826_v31 = vpack.c.bf16 %v3927_v29, %v3926_v26  ;;  %v1820_v34 = vpop.f32.mrb[67].mxu0  ;;  %v4271_v26 = vld [vmem:[#allocation11 + $0x108] sm:$0xff]   ;;  %v4274_v29 = vld [vmem:[#allocation11 + $0x120] sm:$0xff]  }
 0x1de   : > { %3876 = vmatprep.subr.bf16.mxu1 %v1529_v1  ;;  %v1880_v35 = vpack.c.bf16 %v1820_v34, %v1817_v27  ;;  %v4272_v27 = vld [vmem:[#allocation11 + $0x110] sm:$0xff]   ;;  %v4277_v34 = vld [vmem:[#allocation11 + $0x138] sm:$0xff]  }
 0x1e0   : > { %3829 = vmatmul.mubr.bf16.vlgmr.msra.gmra.mrb[0].mxu1 %v4255_v28  ;;  %v4273_v28 = vld [vmem:[#allocation11 + $0x118] sm:$0xff]  }
 0x1e1   : > { %3877 = vmatpush3.bf16.msra.mxu1 %v1529_v1  ;;  %3832 = vmatprep.mubr.bf16.mxu1 %v4256_v30  ;;  %v4275_v30 = vld [vmem:[#allocation11 + $0x128] sm:$0xff]  }
 0x1e2   : > { %3878 = vmatprep.subr.bf16.mxu1 %v4812_v63  ;;  %v3930_v36 = vpop.f32.mrb[68].mxu0 }
 0x1e3   : > { %v1833_v37 = vpop.f32.mrb[69].mxu0 }
 0x1e4   : > { %v3931_v39 = vpop.f32.mrb[70].mxu0 }
 0x1e5   : > { %3879 = vmatpush3.bf16.msra.mxu1 %v4812_v63  ;;  %v4830_v43 = vpack.c.bf16 %v3931_v39, %v3930_v36  ;;  %v1836_v44 = vpop.f32.mrb[71].mxu0  ;;  %v4279_v36 = vld [vmem:[#allocation11 + $0x148] sm:$0xff]   ;;  %v4282_v39 = vld [vmem:[#allocation11 + $0x160] sm:$0xff]  }
 0x1e6   : > { %3880 = vmatprep.subr.bf16.mxu1 %v1531_v8  ;;  %v1882_v45 = vpack.c.bf16 %v1836_v44, %v1833_v37  ;;  %v4280_v37 = vld [vmem:[#allocation11 + $0x150] sm:$0xff]   ;;  %v4285_v44 = vld [vmem:[#allocation11 + $0x178] sm:$0xff]  }
 0x1e8   : > { %3833 = vmatmul.mubr.bf16.gmra.mrb[4].mxu1 %v4257_v38  ;;  %v4281_v38 = vld [vmem:[#allocation11 + $0x158] sm:$0xff]  }
 0x1e9   : > { %3881 = vmatpush3.bf16.msra.mxu1 %v1531_v8  ;;  %3836 = vmatprep.mubr.bf16.mxu1 %v4258_v42  ;;  %v4283_v42 = vld [vmem:[#allocation11 + $0x168] sm:$0xff]  }
 0x1ea   : > { %3882 = vmatprep.subr.bf16.mxu1 %v4814_v6  ;;  %v3934_v18 = vpop.f32.mrb[72].mxu0 }
 0x1eb   : > { %v1849_v46 = vpop.f32.mrb[73].mxu0 }
 0x1ec   : > { %v3935_v32 = vpop.f32.mrb[74].mxu0 }
 0x1ed   : > { %3883 = vmatpush3.bf16.msra.mxu1 %v4814_v6  ;;  %v4834_v49 = vpack.c.bf16 %v3935_v32, %v3934_v18  ;;  %v1852_v51 = vpop.f32.mrb[75].mxu0 }
 0x1ee   : > { %3884 = vmatprep.subr.bf16.mxu1 %v1533_v16  ;;  %v1884_v52 = vpack.c.bf16 %v1852_v51, %v1849_v46 }
 0x1f0   : > { %3837 = vmatmul.mubr.bf16.gmra.mrb[8].mxu1 %v4259_v47 }
 0x1f1   : > { %3885 = vmatpush3.bf16.msra.mxu1 %v1533_v16  ;;  %3840 = vmatprep.mubr.bf16.mxu1 %v4260_v33 }
 0x1f2   : > { %3886 = vmatprep.subr.bf16.mxu1 %v4818_v14  ;;  %v3938_v53 = vpop.f32.mrb[76].mxu0 }
 0x1f3   : > { %v1865_v40 = vpop.f32.mrb[77].mxu0 }
 0x1f4   : > { %v3939_v55 = vpop.f32.mrb[78].mxu0 }
 0x1f5   : > { %3887 = vmatpush3.bf16.msra.mxu1 %v4818_v14  ;;  %v4838_v57 = vpack.c.bf16 %v3939_v55, %v3938_v53  ;;  %v1868_v58 = vpop.f32.mrb[79].mxu0 }
 0x1f6   : > { %3888 = vmatprep.subr.bf16.mxu1 %v1535_v25  ;;  %v1886_v59 = vpack.c.bf16 %v1868_v58, %v1865_v40 }
 0x1f8   : > { %3841 = vmatmul.mubr.bf16.gmra.mrb[12].mxu1 %v4261_v41 }
 0x1f9   : > { %3889 = vmatpush3.bf16.msra.mxu1 %v1535_v25  ;;  %3892 = vmatprep.mubr.bf16.mxu1 %v4262_v56 }
 0x1fa   : > { %3890 = vmatprep.subr.bf16.mxu1 %v4822_v23  ;;  %v3990_v48 = vpop.f32.mrb[80].mxu0 }
 0x1fb   : > { %v2168_v60 = vpop.f32.mrb[81].mxu0 }
 0x1fc   : > { %v3991_v50 = vpop.f32.mrb[82].mxu0 }
 0x1fd   : > { %3891 = vmatpush3.bf16.msra.mxu1 %v4822_v23  ;;  %v2232_v63 = vpack.c.bf16 %v3991_v50, %v3990_v48  ;;  %v2171_v0 = vpop.f32.mrb[83].mxu0 }
 0x1fe   : > { %3940 = vmatprep.subr.bf16.mxu1 %v1880_v35  ;;  %v2231_v1 = vpack.c.bf16 %v2171_v0, %v2168_v60 }
 0x200   : > { %3893 = vmatmul.mubr.bf16.vlgmr.msra.gmra.mrb[0].mxu1 %v4263_v61 }
 0x201   : > { %3941 = vmatpush3.bf16.msra.mxu1 %v1880_v35  ;;  %3896 = vmatprep.mubr.bf16.mxu1 %v4264_v62  ;;  %v4278_v35 = vld [vmem:[#allocation11 + $0x140] sm:$0xff]  }
 0x202   : > { %3942 = vmatprep.subr.bf16.mxu1 %v4826_v31  ;;  %v3994_v2 = vpop.f32.mrb[84].mxu0 }
 0x203   : > { %v2184_v54 = vpop.f32.mrb[85].mxu0 }
 0x204   : > { %v3995_v4 = vpop.f32.mrb[86].mxu0 }
 0x205   : > { %3943 = vmatpush3.bf16.msra.mxu1 %v4826_v31  ;;  %v2234_v6 = vpack.c.bf16 %v3995_v4, %v3994_v2  ;;  %v2187_v7 = vpop.f32.mrb[87].mxu0  ;;  %v4276_v31 = vld [vmem:[#allocation11 + $0x130] sm:$0xff]  }
 0x206   : > { %3944 = vmatprep.subr.bf16.mxu1 %v1882_v45  ;;  %v2233_v8 = vpack.c.bf16 %v2187_v7, %v2184_v54 }
 0x208   : > { %3897 = vmatmul.mubr.bf16.gmra.mrb[4].mxu1 %v4265_v3 }
 0x209   : > { %3945 = vmatpush3.bf16.msra.mxu1 %v1882_v45  ;;  %3900 = vmatprep.mubr.bf16.mxu1 %v4266_v5 }
 0x20a   : > { %3946 = vmatprep.subr.bf16.mxu1 %v4830_v43  ;;  %v3998_v9 = vpop.f32.mrb[88].mxu0 }
 0x20b   : > { %v2200_v10 = vpop.f32.mrb[89].mxu0 }
 0x20c   : > { %v3999_v12 = vpop.f32.mrb[90].mxu0 }
 0x20d   : > { %3947 = vmatpush3.bf16.msra.mxu1 %v4830_v43  ;;  %v2236_v14 = vpack.c.bf16 %v3999_v12, %v3998_v9  ;;  %v2203_v15 = vpop.f32.mrb[91].mxu0  ;;  %v4284_v43 = vld [vmem:[#allocation11 + $0x170] sm:$0xff]  }
 0x20e   : > { %3948 = vmatprep.subr.bf16.mxu1 %v1884_v52  ;;  %v2235_v16 = vpack.c.bf16 %v2203_v15, %v2200_v10 }
 0x210   : > { %3901 = vmatmul.mubr.bf16.gmra.mrb[8].mxu1 %v4267_v11 }
 0x211   : > { %3949 = vmatpush3.bf16.msra.mxu1 %v1884_v52  ;;  %3904 = vmatprep.mubr.bf16.mxu1 %v4268_v13 }
 0x212   : > { %3950 = vmatprep.subr.bf16.mxu1 %v4834_v49  ;;  %v4002_v17 = vpop.f32.mrb[92].mxu0 }
 0x213   : > { %v2216_v19 = vpop.f32.mrb[93].mxu0 }
 0x214   : > { %v4003_v21 = vpop.f32.mrb[94].mxu0 }
 0x215   : > { %3951 = vmatpush3.bf16.msra.mxu1 %v4834_v49  ;;  %v2238_v23 = vpack.c.bf16 %v4003_v21, %v4002_v17  ;;  %v2219_v24 = vpop.f32.mrb[95].mxu0 }
 0x216   : > { %3952 = vmatprep.subr.bf16.mxu1 %v1886_v59  ;;  %v2237_v25 = vpack.c.bf16 %v2219_v24, %v2216_v19 }
 0x218   : > { %3905 = vmatmul.mubr.bf16.gmra.mrb[12].mxu1 %v4269_v20 }
 0x219   : > { %3953 = vmatpush3.bf16.msra.mxu1 %v1886_v59  ;;  %3956 = vmatprep.mubr.bf16.mxu1 %v4270_v22 }
 0x21a   : > { %3954 = vmatprep.subr.bf16.mxu1 %v4838_v57 }
 0x21d   : > { %3955 = vmatpush3.bf16.msra.mxu1 %v4838_v57 }
 0x21e   : > { %4004 = vmatprep.subr.bf16.mxu1 %v2231_v1 }
 0x220   : > { %3957 = vmatmul.mubr.bf16.vlgmr.msra.gmra.mrb[0].mxu1 %v4271_v26 }
 0x221   : > { %4005 = vmatpush3.bf16.msra.mxu1 %v2231_v1  ;;  %3960 = vmatprep.mubr.bf16.mxu1 %v4272_v27 }
 0x222   : > { %4006 = vmatprep.subr.bf16.mxu1 %v2232_v63 }
 0x225   : > { %4007 = vmatpush3.bf16.msra.mxu1 %v2232_v63 }
 0x226   : > { %4008 = vmatprep.subr.bf16.mxu1 %v2233_v8 }
 0x228   : > { %3961 = vmatmul.mubr.bf16.gmra.mrb[4].mxu1 %v4273_v28 }
 0x229   : > { %4009 = vmatpush3.bf16.msra.mxu1 %v2233_v8  ;;  %3964 = vmatprep.mubr.bf16.mxu1 %v4274_v29 }
 0x22a   : > { %4010 = vmatprep.subr.bf16.mxu1 %v2234_v6 }
 0x22d   : > { %4011 = vmatpush3.bf16.msra.mxu1 %v2234_v6 }
 0x22e   : > { %4012 = vmatprep.subr.bf16.mxu1 %v2235_v16 }
 0x230   : > { %3965 = vmatmul.mubr.bf16.gmra.mrb[8].mxu1 %v4275_v30  ;;  %v4286_v30 = vld [vmem:[%s4902_s1] sm:$0xff]  }
 0x231   : > { %4013 = vmatpush3.bf16.msra.mxu1 %v2235_v16  ;;  %3968 = vmatprep.mubr.bf16.mxu1 %v4276_v31 }
 0x232   : > { %4014 = vmatprep.subr.bf16.mxu1 %v2236_v14  ;;  %4036 = vmatprep.subr.bf16.mxu0 %v4286_v30 }
 0x233   : > { %4037 = vmatpush3.bf16.msra.mxu0 %v4286_v30 }
 0x235   : > { %4015 = vmatpush3.bf16.msra.mxu1 %v2236_v14 }
 0x236   : > { %4016 = vmatprep.subr.bf16.mxu1 %v2237_v25 }
 0x238   : > { %3969 = vmatmul.mubr.bf16.gmra.mrb[12].mxu1 %v4277_v34 }
 0x239   : > { %4017 = vmatpush3.bf16.msra.mxu1 %v2237_v25  ;;  %4020 = vmatprep.mubr.bf16.mxu1 %v4278_v35 }
 0x23a   : > { %4018 = vmatprep.subr.bf16.mxu1 %v2238_v23 }
 0x23d   : > { %4019 = vmatpush3.bf16.msra.mxu1 %v2238_v23 }
 0x240   : > { %4021 = vmatmul.mubr.bf16.vlgmr.msra.gmra.mrb[0].mxu1 %v4279_v36 }
 0x241   : > { %4024 = vmatprep.mubr.bf16.mxu1 %v4280_v37 }
 0x248   : > { %4025 = vmatmul.mubr.bf16.gmra.mrb[4].mxu1 %v4281_v38 }
 0x249   : > { %4028 = vmatprep.mubr.bf16.mxu1 %v4282_v39 }
 0x250   : > { %4029 = vmatmul.mubr.bf16.gmra.mrb[8].mxu1 %v4283_v42 }
 0x251   : > { %4032 = vmatprep.mubr.bf16.mxu1 %v4284_v43 }
 0x258   : > { %4033 = vmatmul.mubr.bf16.gmra.mrb[12].mxu1 %v4285_v44 }
 0x313   : > { %v4022_v45 = vpop.f32.mrb[0].mxu1 }
 0x314   : > { %2425 = vadd.xlane.f32.xlu1 %v4022_v45  ;;  %v2338_v18 = vpop.f32.mrb[1].mxu1 }
 0x315   : > { %2421 = vadd.xlane.f32.xlu0 %v2338_v18  ;;  %v4023_v46 = vpop.f32.mrb[2].mxu1 }
 0x316   : > { %v2341_v47 = vpop.f32.mrb[3].mxu1 }
 0x318   : > { %2427 = vadd.xlane.f32.xlu1 %v4023_v46 }
 0x319   : > { %2423 = vadd.xlane.f32.xlu0 %v2341_v47 }
 0x31b   : > { %v4026_v32 = vpop.f32.mrb[4].mxu1 }
 0x31c   : > { %v2354_v33 = vpop.f32.mrb[5].mxu1 }
 0x31d   : > { %2429 = vadd.xlane.f32.xlu0 %v2354_v33  ;;  %v4027_v49 = vpop.f32.mrb[6].mxu1 }
 0x31e   : > { %v2357_v51 = vpop.f32.mrb[7].mxu1 }
 0x31f   : > { %2431 = vadd.xlane.f32.xlu1 %v2357_v51 }
 0x321   : > { %2433 = vadd.xlane.f32.xlu0 %v4026_v32 }
 0x323   : > { %2435 = vadd.xlane.f32.xlu1 %v4027_v49  ;;  %v4850_v52 = vpop.f32.mrb[8].mxu1 }
 0x324   : > { %v2370_v53 = vpop.f32.mrb[9].mxu1 }
 0x325   : > { %2437 = vadd.xlane.f32.xlu0 %v2370_v53  ;;  %v4852_v40 = vpop.f32.mrb[10].mxu1 }
 0x326   : > { %v2373_v41 = vpop.f32.mrb[11].mxu1 }
 0x327   : > { %2439 = vadd.xlane.f32.xlu1 %v2373_v41 }
 0x329   : > { %2441 = vadd.xlane.f32.xlu0 %v4850_v52 }
 0x32b   : > { %2443 = vadd.xlane.f32.xlu1 %v4852_v40  ;;  %v4856_v55 = vpop.f32.mrb[12].mxu1 }
 0x32c   : > { %v4858_v56 = vpop.f32.mrb[13].mxu1 }
 0x32d   : > { %2445 = vadd.xlane.f32.xlu0 %v4858_v56  ;;  %v4861_v57 = vpop.f32.mrb[14].mxu1 }
 0x32e   : > { %v4863_v58 = vpop.f32.mrb[15].mxu1 }
 0x32f   : > { %2447 = vadd.xlane.f32.xlu1 %v4863_v58 }
 0x331   : > { %2449 = vadd.xlane.f32.xlu0 %v4856_v55 }
 0x333   : > { %2451 = vadd.xlane.f32.xlu1 %v4861_v57 }
 0x3a1   : > { %v2426_v59 = vpop.xlane.xlu1 %2425 }
 0x3a2   : > { %v2422_v48 = vpop.xlane.xlu0 %2421  ;;  %v2456_v60 = vmul.f32 0.0078125, %v2426_v59 }
 0x3a3   : > { %v2454_v61 = vmul.f32 0.0078125, %v2422_v48 }
 0x3a4   : > { %v4870_v0 = vsub.f32 %v4022_v45, %v2456_v60 }
 0x3a5   : > { %v4868_v50 = vsub.f32 %v2338_v18, %v2454_v61  ;;  %v2428_v62 = vpop.xlane.xlu1 %2427 }
 0x3a6   : > { %v2424_v63 = vpop.xlane.xlu0 %2423  ;;  %v2457_v1 = vmul.f32 0.0078125, %v2428_v62  ;;  %v2488_v7 = vmul.f32 %v4870_v0, %v4870_v0  ;;  %v4289_v62 = vld [vmem:[%s4902_s1 + $0x18] sm:$0xff]  }
 0x3a7   : > { %v2455_v2 = vmul.f32 0.0078125, %v2424_v63  ;;  %v2486_v54 = vmul.f32 %v4868_v50, %v4868_v50  ;;  %v4290_v63 = vld [vmem:[%s4902_s1 + $0x20] sm:$0xff]  }
 0x3a8   : > { %v4876_v5 = vsub.f32 %v4023_v46, %v2457_v1  ;;  %v4287_v46 = vld [vmem:[%s4902_s1 + $0x8] sm:$0xff]   ;;  %v4292_v1 = vld [vmem:[%s4902_s1 + $0x30] sm:$0xff]  }
 0x3a9   : > { %v4874_v3 = vsub.f32 %v2341_v47, %v2455_v2  ;;  %2502 = vadd.xlane.f32.xlu0 %v2486_v54  ;;  %4038 = vmatprep.subr.bf16.mxu0 %v4287_v46  ;;  %v4293_v2 = vld [vmem:[%s4902_s1 + $0x38] sm:$0xff]  }
 0x3aa   : > { %v2430_v4 = vpop.xlane.xlu0 %2429  ;;  %v2489_v16 = vmul.f32 %v4876_v5, %v4876_v5  ;;  %4039 = vmatpush3.bf16.msra.mxu0 %v4287_v46 }
 0x3ab   : > { %v2458_v6 = vmul.f32 0.0078125, %v2430_v4  ;;  %v2487_v8 = vmul.f32 %v4874_v3, %v4874_v3 }
 0x3ac   : > { %v2432_v9 = vpop.xlane.xlu1 %2431 }
 0x3ad   : > { %v4882_v10 = vsub.f32 %v2354_v33, %v2458_v6  ;;  %v2459_v11 = vmul.f32 0.0078125, %v2432_v9  ;;  %2506 = vadd.xlane.f32.xlu0 %v2488_v7  ;;  %2504 = vadd.xlane.f32.xlu1 %v2487_v8 }
 0x3ae   : > { %v2434_v12 = vpop.xlane.xlu0 %2433 }
 0x3af   : > { %v4884_v13 = vsub.f32 %v2357_v51, %v2459_v11  ;;  %v2460_v14 = vmul.f32 0.0078125, %v2434_v12  ;;  %v2490_v15 = vmul.f32 %v4882_v10, %v4882_v10 }
 0x3b0   : > { %v2436_v17 = vpop.xlane.xlu1 %2435 }
 0x3b1   : > { %v4890_v19 = vsub.f32 %v4026_v32, %v2460_v14  ;;  %v2461_v20 = vmul.f32 0.0078125, %v2436_v17  ;;  %2510 = vadd.xlane.f32.xlu0 %v2490_v15  ;;  %2508 = vadd.xlane.f32.xlu1 %v2489_v16  ;;  %v2491_v25 = vmul.f32 %v4884_v13, %v4884_v13 }
 0x3b2   : > { %v2438_v21 = vpop.xlane.xlu0 %2437 }
 0x3b3   : > { %v4892_v22 = vsub.f32 %v4027_v49, %v2461_v20  ;;  %v2462_v23 = vmul.f32 0.0078125, %v2438_v21  ;;  %v2492_v24 = vmul.f32 %v4890_v19, %v4890_v19 }
 0x3b4   : > { %v2440_v26 = vpop.xlane.xlu1 %2439 }
 0x3b5   : > { %v4898_v27 = vsub.f32 %v2370_v53, %v2462_v23  ;;  %v2463_v28 = vmul.f32 0.0078125, %v2440_v26  ;;  %2514 = vadd.xlane.f32.xlu0 %v2492_v24  ;;  %2512 = vadd.xlane.f32.xlu1 %v2491_v25  ;;  %v2493_v36 = vmul.f32 %v4892_v22, %v4892_v22 }
 0x3b6   : > { %v2442_v29 = vpop.xlane.xlu0 %2441 }
 0x3b7   : > { %v4905_v31 = vsub.f32 %v2373_v41, %v2463_v28  ;;  %v2464_v34 = vmul.f32 0.0078125, %v2442_v29  ;;  %v2494_v35 = vmul.f32 %v4898_v27, %v4898_v27  ;;  %v4288_v41 = vld [vmem:[%s4902_s1 + $0x10] sm:$0xff]  }
 0x3b8   : > { %v2444_v37 = vpop.xlane.xlu1 %2443  ;;  %4040 = vmatprep.subr.bf16.mxu0 %v4288_v41 }
 0x3b9   : > { %v4912_v38 = vsub.f32 %v4850_v52, %v2464_v34  ;;  %v2465_v39 = vmul.f32 0.0078125, %v2444_v37  ;;  %2518 = vadd.xlane.f32.xlu0 %v2494_v35  ;;  %2516 = vadd.xlane.f32.xlu1 %v2493_v36  ;;  %v2495_v18 = vmul.f32 %v4905_v31, %v4905_v31 }
 0x3ba   : > { %v2446_v42 = vpop.xlane.xlu0 %2445  ;;  %4041 = vmatpush3.bf16.msra.mxu0 %v4288_v41  ;;  %v4963_v41 = vld [vmem:[%s2419_s0] ss:$0 sm:$0xff] }
 0x3bb   : > { %v4915_v43 = vsub.f32 %v4852_v40, %v2465_v39  ;;  %v2466_v44 = vmul.f32 0.0078125, %v2446_v42  ;;  %v2496_v45 = vmul.f32 %v4912_v38, %v4912_v38  ;;  %4042 = vmatprep.subr.bf16.mxu0 %v4289_v62  ;;  %v4955_v39 = vld [vmem:[%s2417_s15] ss:$0 sm:$0xff] }
 0x3bc   : > { %v2448_v47 = vpop.xlane.xlu1 %2447 }
 0x3bd   : > { %v4923_v32 = vsub.f32 %v4858_v56, %v2466_v44  ;;  %v2467_v33 = vmul.f32 0.0078125, %v2448_v47  ;;  %2522 = vadd.xlane.f32.xlu0 %v2496_v45  ;;  %2520 = vadd.xlane.f32.xlu1 %v2495_v18  ;;  %v2497_v40 = vmul.f32 %v4915_v43, %v4915_v43 }
 0x3be   : > { %v2450_v49 = vpop.xlane.xlu0 %2449  ;;  %4043 = vmatpush3.bf16.msra.mxu0 %v4289_v62 }
 0x3bf   : > { %v4926_v51 = vsub.f32 %v4863_v58, %v2467_v33  ;;  %v2468_v52 = vmul.f32 0.0078125, %v2450_v49  ;;  %v2498_v53 = vmul.f32 %v4923_v32, %v4923_v32  ;;  %4044 = vmatprep.subr.bf16.mxu0 %v4290_v63 }
 0x3c0   : > { %v2452_v56 = vpop.xlane.xlu1 %2451 }
 0x3c1   : > { %v4934_v59 = vsub.f32 %v4856_v55, %v2468_v52  ;;  %v2469_v48 = vmul.f32 0.0078125, %v2452_v56  ;;  %2526 = vadd.xlane.f32.xlu0 %v2498_v53  ;;  %2524 = vadd.xlane.f32.xlu1 %v2497_v40  ;;  %v2499_v61 = vmul.f32 %v4926_v51, %v4926_v51 }
 0x3c2   : > { %4045 = vmatpush3.bf16.msra.mxu0 %v4290_v63 }
 0x3c3   : > { %v4937_v58 = vsub.f32 %v4861_v57, %v2469_v48  ;;  %v2500_v60 = vmul.f32 %v4934_v59, %v4934_v59  ;;  %v4291_v57 = vld [vmem:[%s4902_s1 + $0x28] sm:$0xff]  }
 0x3c4   : > { %4046 = vmatprep.subr.bf16.mxu0 %v4291_v57 }
 0x3c5   : > { %2530 = vadd.xlane.f32.xlu0 %v2500_v60  ;;  %2528 = vadd.xlane.f32.xlu1 %v2499_v61  ;;  %v2501_v55 = vmul.f32 %v4937_v58, %v4937_v58 }
 0x3c6   : > { %4047 = vmatpush3.bf16.msra.mxu0 %v4291_v57 }
 0x3c7   : > { %4048 = vmatprep.subr.bf16.mxu0 %v4292_v1 }
 0x3c9   : > { %2532 = vadd.xlane.f32.xlu1 %v2501_v55 }
 0x3ca   : > { %4049 = vmatpush3.bf16.msra.mxu0 %v4292_v1 }
 0x3cb   : > { %4050 = vmatprep.subr.bf16.mxu0 %v4293_v2 }
 0x3ce   : > { %4051 = vmatpush3.bf16.msra.mxu0 %v4293_v2 }
 0x436   : > { %v2503_v54 = vpop.xlane.xlu0 %2502 }
 0x437   : > { %v2534_v4 = vmul.f32 0.0078125, %v2503_v54 }
 0x439   : > { %v2550_v6 = vadd.f32 1e-05, %v2534_v4 }
 0x43a   : > { %v2507_v7 = vpop.xlane.xlu0 %2506  ;;  %v2505_v8 = vpop.xlane.xlu1 %2504 }
 0x43b   : > { %4294 = vrsqrt.f32 %v2550_v6  ;;  %v2536_v9 = vmul.f32 0.0078125, %v2507_v7  ;;  %v2535_v11 = vmul.f32 0.0078125, %v2505_v8 }
 0x43d   : > { %v2552_v12 = vadd.f32 1e-05, %v2536_v9  ;;  %v2551_v14 = vadd.f32 1e-05, %v2535_v11 }
 0x43e   : > { %v2511_v15 = vpop.xlane.xlu0 %2510  ;;  %v2509_v16 = vpop.xlane.xlu1 %2508 }
 0x43f   : > { %4296 = vrsqrt.f32 %v2552_v12  ;;  %v2538_v17 = vmul.f32 0.0078125, %v2511_v15  ;;  %v2537_v20 = vmul.f32 0.0078125, %v2509_v16 }
 0x440   : > { %4298 = vrsqrt.f32 %v2551_v14 }
 0x441   : > { %v2554_v21 = vadd.f32 1e-05, %v2538_v17  ;;  %v2553_v23 = vadd.f32 1e-05, %v2537_v20 }
 0x442   : > { %v2515_v24 = vpop.xlane.xlu0 %2514  ;;  %v2513_v25 = vpop.xlane.xlu1 %2512 }
 0x443   : > { %4300 = vrsqrt.f32 %v2554_v21  ;;  %v2540_v26 = vmul.f32 0.0078125, %v2515_v24  ;;  %v2539_v28 = vmul.f32 0.0078125, %v2513_v25 }
 0x444   : > { %4302 = vrsqrt.f32 %v2553_v23 }
 0x445   : > { %v4295_v29 = vpop.eup %4294  ;;  %v2556_v30 = vadd.f32 1e-05, %v2540_v26  ;;  %v2555_v34 = vadd.f32 1e-05, %v2539_v28 }
 0x446   : > { %v2519_v35 = vpop.xlane.xlu0 %2518  ;;  %v2517_v36 = vpop.xlane.xlu1 %2516  ;;  %v2582_v37 = vmul.f32 %v4295_v29, %v4868_v50 }
 0x447   : > { %4304 = vrsqrt.f32 %v2556_v30  ;;  %v2542_v42 = vmul.f32 0.0078125, %v2519_v35  ;;  %v2541_v44 = vmul.f32 0.0078125, %v2517_v36 }
 0x448   : > { %4306 = vrsqrt.f32 %v2555_v34  ;;  %v2604_v50 = vmul.f32 %v4955_v39, %v2582_v37 }
 0x449   : > { %v4297_v45 = vpop.eup %4296  ;;  %v2558_v18 = vadd.f32 1e-05, %v2542_v42  ;;  %v2557_v46 = vadd.f32 1e-05, %v2541_v44 }
 0x44a   : > { %v4299_v47 = vpop.eup %4298  ;;  %v2584_v33 = vmul.f32 %v4297_v45, %v4870_v0  ;;  %v2523_v49 = vpop.xlane.xlu0 %2522  ;;  %v2626_v1 = vadd.f32 %v4963_v41, %v2604_v50 }
 0x44b   : > { %v2521_v52 = vpop.xlane.xlu1 %2520  ;;  %4308 = vrsqrt.f32 %v2558_v18  ;;  %v2544_v53 = vmul.f32 0.0078125, %v2523_v49  ;;  %v2583_v56 = vmul.f32 %v4299_v47, %v4874_v3 }
 0x44c   : > { %v2543_v40 = vmul.f32 0.0078125, %v2521_v52  ;;  %v2606_v48 = vmul.f32 %v4955_v39, %v2584_v33  ;;  %4310 = vrsqrt.f32 %v2557_v46  ;;  %v2642_v17 = vmax.f32 %v2626_v1, 0.0 }
 0x44d   : > { %v4301_v60 = vpop.eup %4300  ;;  %v2560_v61 = vadd.f32 1e-05, %v2544_v53  ;;  %v2605_v55 = vmul.f32 %v4955_v39, %v2583_v56 }
 0x44e   : > { %v2559_v62 = vadd.f32 1e-05, %v2543_v40  ;;  %v4303_v0 = vpop.eup %4302  ;;  %v2527_v63 = vpop.xlane.xlu0 %2526  ;;  %v2586_v2 = vmul.f32 %v4301_v60, %v4882_v10  ;;  %v2628_v7 = vadd.f32 %v4963_v41, %v2606_v48 }
 0x44f   : > { %v2525_v57 = vpop.xlane.xlu1 %2524  ;;  %v2585_v54 = vmul.f32 %v4303_v0, %v4876_v5  ;;  %4312 = vrsqrt.f32 %v2560_v61  ;;  %v2546_v4 = vmul.f32 0.0078125, %v2527_v63  ;;  %v2627_v6 = vadd.f32 %v4963_v41, %v2605_v55 }
 0x450   : > { %v2545_v3 = vmul.f32 0.0078125, %v2525_v57  ;;  %4314 = vrsqrt.f32 %v2559_v62  ;;  %v2608_v5 = vmul.f32 %v4955_v39, %v2586_v2  ;;  %v2644_v26 = vmax.f32 %v2628_v7, 0.0 }
 0x451   : > { %v4305_v8 = vpop.eup %4304  ;;  %v2607_v9 = vmul.f32 %v4955_v39, %v2585_v54  ;;  %v2562_v11 = vadd.f32 1e-05, %v2546_v4  ;;  %v2643_v10 = vmax.f32 %v2627_v6, 0.0 }
 0x452   : > { %v2561_v12 = vadd.f32 1e-05, %v2545_v3  ;;  %v4307_v14 = vpop.eup %4306  ;;  %v2531_v15 = vpop.xlane.xlu0 %2530  ;;  %v2588_v20 = vmul.f32 %v4305_v8, %v4890_v19  ;;  %v2630_v44 = vadd.f32 %v4963_v41, %v2608_v5 }
 0x453   : > { %v2529_v16 = vpop.xlane.xlu1 %2528  ;;  %4316 = vrsqrt.f32 %v2562_v11  ;;  %v2548_v21 = vmul.f32 0.0078125, %v2531_v15  ;;  %v2629_v24 = vadd.f32 %v4963_v41, %v2607_v9  ;;  %v2658_v25 = vpack.c.bf16 %v2643_v10, %v2642_v17 }
 0x454   : > { %v2547_v23 = vmul.f32 0.0078125, %v2529_v16  ;;  %4318 = vrsqrt.f32 %v2561_v12  ;;  %v2587_v28 = vmul.f32 %v4307_v14, %v4884_v13  ;;  %v2610_v36 = vmul.f32 %v4955_v39, %v2588_v20 }
 0x455   : > { %v4309_v29 = vpop.eup %4308  ;;  %v2564_v30 = vadd.f32 1e-05, %v2548_v21  ;;  %v2645_v35 = vmax.f32 %v2629_v24, 0.0  ;;  %4052 = vmatprep.mubr.bf16.mxu0 %v2658_v25  ;;  %v2646_v56 = vmax.f32 %v2630_v44, 0.0 }
 0x456   : > { %v2563_v34 = vadd.f32 1e-05, %v2547_v23  ;;  %v4311_v37 = vpop.eup %4310  ;;  %v2609_v19 = vmul.f32 %v4955_v39, %v2587_v28  ;;  %v2590_v45 = vmul.f32 %v4309_v29, %v4898_v27  ;;  %v2632_v53 = vadd.f32 %v4963_v41, %v2610_v36 }
 0x457   : > { %v2533_v42 = vpop.xlane.xlu1 %2532  ;;  %4320 = vrsqrt.f32 %v2564_v30  ;;  %v2659_v46 = vpack.c.bf16 %v2645_v35, %v2644_v26  ;;  %v2589_v13 = vmul.f32 %v4311_v37, %v4892_v22 }
 0x458   : > { %v2549_v18 = vmul.f32 0.0078125, %v2533_v42  ;;  %4322 = vrsqrt.f32 %v2563_v34  ;;  %v2631_v47 = vadd.f32 %v4963_v41, %v2609_v19  ;;  %v2612_v33 = vmul.f32 %v4955_v39, %v2590_v45 }
 0x459   : > { %v4313_v49 = vpop.eup %4312  ;;  %4053 = vmatmul.mubr.bf16.vlgmr.msra.gmra.mrb[96].mxu0 %v2659_v46  ;;  %v2611_v50 = vmul.f32 %v4955_v39, %v2589_v13  ;;  %v2648_v0 = vmax.f32 %v2632_v53, 0.0 }
 0x45a   : > { %v2565_v52 = vadd.f32 1e-05, %v2549_v18  ;;  %v4315_v40 = vpop.eup %4314  ;;  %v2647_v27 = vmax.f32 %v2631_v47, 0.0  ;;  %v2592_v48 = vmul.f32 %v4313_v49, %v4912_v38  ;;  %v2634_v62 = vadd.f32 %v4963_v41, %v2612_v33 }
 0x45b   : > { %v2633_v22 = vadd.f32 %v4963_v41, %v2611_v50  ;;  %v2591_v60 = vmul.f32 %v4315_v40, %v4905_v31 }
 0x45c   : > { %4324 = vrsqrt.f32 %v2565_v52  ;;  %v2660_v61 = vpack.c.bf16 %v2647_v27, %v2646_v56  ;;  %v2614_v1 = vmul.f32 %v4955_v39, %v2592_v48  ;;  %v2650_v31 = vmax.f32 %v2634_v62, 0.0 }
 0x45d   : > { %v4317_v55 = vpop.eup %4316  ;;  %v2649_v63 = vmax.f32 %v2633_v22, 0.0  ;;  %v2613_v57 = vmul.f32 %v4955_v39, %v2591_v60 }
 0x45e   : > { %v4319_v2 = vpop.eup %4318  ;;  %4056 = vmatprep.mubr.bf16.mxu0 %v2660_v61  ;;  %v2594_v54 = vmul.f32 %v4317_v55, %v4923_v32  ;;  %v2636_v9 = vadd.f32 %v4963_v41, %v2614_v1 }
 0x45f   : > { %v2661_v38 = vpack.c.bf16 %v2649_v63, %v2648_v0  ;;  %v2635_v4 = vadd.f32 %v4963_v41, %v2613_v57  ;;  %v2593_v3 = vmul.f32 %v4319_v2, %v4915_v43 }
 0x460   : > { %v2616_v11 = vmul.f32 %v4955_v39, %v2594_v54  ;;  %v2652_v10 = vmax.f32 %v2636_v9, 0.0 }
 0x461   : > { %v4321_v6 = vpop.eup %4320  ;;  %4057 = vmatmul.mubr.bf16.gmra.mrb[100].mxu0 %v2661_v38  ;;  %v2651_v7 = vmax.f32 %v2635_v4, 0.0  ;;  %v2615_v8 = vmul.f32 %v4955_v39, %v2593_v3 }
 0x462   : > { %v4323_v12 = vpop.eup %4322  ;;  %v2596_v14 = vmul.f32 %v4321_v6, %v4934_v59  ;;  %v2638_v21 = vadd.f32 %v4963_v41, %v2616_v11 }
 0x463   : > { %v2662_v15 = vpack.c.bf16 %v2651_v7, %v2650_v31  ;;  %v2637_v32 = vadd.f32 %v4963_v41, %v2615_v8  ;;  %v2595_v16 = vmul.f32 %v4323_v12, %v4926_v51 }
 0x464   : > { %v2618_v43 = vmul.f32 %v4955_v39, %v2596_v14  ;;  %v2654_v51 = vmax.f32 %v2638_v21, 0.0 }
 0x465   : > { %4060 = vmatprep.mubr.bf16.mxu0 %v2662_v15  ;;  %v2653_v5 = vmax.f32 %v2637_v32, 0.0  ;;  %v2617_v20 = vmul.f32 %v4955_v39, %v2595_v16 }
 0x466   : > { %v4325_v17 = vpop.eup %4324  ;;  %v2640_v26 = vadd.f32 %v4963_v41, %v2618_v43 }
 0x467   : > { %v2597_v23 = vmul.f32 %v4325_v17, %v4937_v58  ;;  %v2663_v24 = vpack.c.bf16 %v2653_v5, %v2652_v10  ;;  %v2639_v59 = vadd.f32 %v4963_v41, %v2617_v20 }
 0x468   : > { %v2656_v34 = vmax.f32 %v2640_v26, 0.0 }
 0x469   : > { %v2619_v25 = vmul.f32 %v4955_v39, %v2597_v23  ;;  %4061 = vmatmul.mubr.bf16.gmra.mrb[104].mxu0 %v2663_v24  ;;  %v2655_v28 = vmax.f32 %v2639_v59, 0.0 }
 0x46b   : > { %v2641_v29 = vadd.f32 %v4963_v41, %v2619_v25  ;;  %v2664_v30 = vpack.c.bf16 %v2655_v28, %v2654_v51 }
 0x46d   : > { %v2657_v35 = vmax.f32 %v2641_v29, 0.0  ;;  %4064 = vmatprep.mubr.bf16.mxu0 %v2664_v30 }
 0x46f   : > { %v2665_v36 = vpack.c.bf16 %v2657_v35, %v2656_v34 }
 0x471   : > { %4065 = vmatmul.mubr.bf16.gmra.mrb[108].mxu0 %v2665_v36 }
 0x52c   : > { %v4054_v37 = vpop.f32.mrb[96].mxu0 }
 0x52d   : > { %2837 = vadd.xlane.f32.xlu0 %v4054_v37  ;;  %v2766_v58 = vpop.f32.mrb[97].mxu0 }
 0x52e   : > { %v4055_v42 = vpop.f32.mrb[98].mxu0 }
 0x52f   : > { %2839 = vadd.xlane.f32.xlu1 %v4055_v42  ;;  %v2769_v19 = vpop.f32.mrb[99].mxu0 }
 0x531   : > { %2833 = vadd.xlane.f32.xlu0 %v2766_v58 }
 0x533   : > { %2835 = vadd.xlane.f32.xlu1 %v2769_v19 }
 0x534   : > { %v4058_v39 = vpop.f32.mrb[100].mxu0 }
 0x535   : > { %2845 = vadd.xlane.f32.xlu0 %v4058_v39  ;;  %v2782_v44 = vpop.f32.mrb[101].mxu0 }
 0x536   : > { %v4059_v45 = vpop.f32.mrb[102].mxu0 }
 0x537   : > { %2847 = vadd.xlane.f32.xlu1 %v4059_v45  ;;  %v2785_v41 = vpop.f32.mrb[103].mxu0 }
 0x539   : > { %2841 = vadd.xlane.f32.xlu0 %v2782_v44 }
 0x53b   : > { %2843 = vadd.xlane.f32.xlu1 %v2785_v41 }
 0x53c   : > { %v4062_v18 = vpop.f32.mrb[104].mxu0 }
 0x53d   : > { %2853 = vadd.xlane.f32.xlu0 %v4062_v18  ;;  %v5010_v46 = vpop.f32.mrb[105].mxu0 }
 0x53e   : > { %v4063_v13 = vpop.f32.mrb[106].mxu0 }
 0x53f   : > { %2855 = vadd.xlane.f32.xlu1 %v4063_v13  ;;  %v5012_v47 = vpop.f32.mrb[107].mxu0 }
 0x541   : > { %2849 = vadd.xlane.f32.xlu0 %v5010_v46 }
 0x543   : > { %2851 = vadd.xlane.f32.xlu1 %v5012_v47 }
 0x544   : > { %v5016_v33 = vpop.f32.mrb[108].mxu0 }
 0x545   : > { %v5018_v49 = vpop.f32.mrb[109].mxu0 }
 0x546   : > { %2857 = vadd.xlane.f32.xlu0 %v5018_v49  ;;  %v5021_v52 = vpop.f32.mrb[110].mxu0 }
 0x547   : > { %v5023_v50 = vpop.f32.mrb[111].mxu0 }
 0x548   : > { %2859 = vadd.xlane.f32.xlu1 %v5023_v50 }
 0x54a   : > { %2861 = vadd.xlane.f32.xlu0 %v5016_v33 }
 0x54c   : > { %2863 = vadd.xlane.f32.xlu1 %v5021_v52 }
 0x5ba   : > { %v2838_v53 = vpop.xlane.xlu0 %2837 }
 0x5bb   : > { %v2867_v40 = vmul.f32 0.0078125, %v2838_v53 }
 0x5bc   : > { %v2840_v56 = vpop.xlane.xlu1 %2839 }
 0x5bd   : > { %v5028_v27 = vsub.f32 %v4054_v37, %v2867_v40  ;;  %v2868_v48 = vmul.f32 0.0078125, %v2840_v56 }
 0x5be   : > { %v2834_v22 = vpop.xlane.xlu0 %2833 }
 0x5bf   : > { %v5030_v60 = vsub.f32 %v4055_v42, %v2868_v48  ;;  %v2865_v61 = vmul.f32 0.0078125, %v2834_v22  ;;  %v2899_v62 = vmul.f32 %v5028_v27, %v5028_v27 }
 0x5c0   : > { %v2836_v55 = vpop.xlane.xlu1 %2835 }
 0x5c1   : > { %v5034_v0 = vsub.f32 %v2766_v58, %v2865_v61  ;;  %v2866_v63 = vmul.f32 0.0078125, %v2836_v55  ;;  %2917 = vadd.xlane.f32.xlu0 %v2899_v62  ;;  %v2900_v57 = vmul.f32 %v5030_v60, %v5030_v60 }
 0x5c2   : > { %v2846_v1 = vpop.xlane.xlu0 %2845 }
 0x5c3   : > { %v5038_v2 = vsub.f32 %v2769_v19, %v2866_v63  ;;  %v2871_v54 = vmul.f32 0.0078125, %v2846_v1  ;;  %2919 = vadd.xlane.f32.xlu1 %v2900_v57  ;;  %v2897_v38 = vmul.f32 %v5034_v0, %v5034_v0 }
 0x5c4   : > { %v2848_v4 = vpop.xlane.xlu1 %2847 }
 0x5c5   : > { %v5042_v3 = vsub.f32 %v4058_v39, %v2871_v54  ;;  %v2872_v31 = vmul.f32 0.0078125, %v2848_v4  ;;  %2913 = vadd.xlane.f32.xlu0 %v2897_v38  ;;  %v2898_v6 = vmul.f32 %v5038_v2, %v5038_v2 }
 0x5c6   : > { %v2842_v7 = vpop.xlane.xlu0 %2841 }
 0x5c7   : > { %v5046_v8 = vsub.f32 %v4059_v45, %v2872_v31  ;;  %v2869_v9 = vmul.f32 0.0078125, %v2842_v7  ;;  %2915 = vadd.xlane.f32.xlu1 %v2898_v6  ;;  %v2903_v11 = vmul.f32 %v5042_v3, %v5042_v3 }
 0x5c8   : > { %v2844_v12 = vpop.xlane.xlu1 %2843 }
 0x5c9   : > { %v5050_v14 = vsub.f32 %v2782_v44, %v2869_v9  ;;  %v2870_v15 = vmul.f32 0.0078125, %v2844_v12  ;;  %2925 = vadd.xlane.f32.xlu0 %v2903_v11  ;;  %v2904_v32 = vmul.f32 %v5046_v8, %v5046_v8 }
 0x5ca   : > { %v2854_v16 = vpop.xlane.xlu0 %2853 }
 0x5cb   : > { %v5054_v43 = vsub.f32 %v2785_v41, %v2870_v15  ;;  %v2875_v17 = vmul.f32 0.0078125, %v2854_v16  ;;  %2927 = vadd.xlane.f32.xlu1 %v2904_v32  ;;  %v2901_v10 = vmul.f32 %v5050_v14, %v5050_v14  ;;  %v5106_v16 = vld [vmem:[%s2829_s21] ss:$0 sm:$0xff] }
 0x5cc   : > { %v2856_v5 = vpop.xlane.xlu1 %2855 }
 0x5cd   : > { %v5058_v20 = vsub.f32 %v4062_v18, %v2875_v17  ;;  %v2876_v21 = vmul.f32 0.0078125, %v2856_v5  ;;  %2921 = vadd.xlane.f32.xlu0 %v2901_v10  ;;  %v2902_v23 = vmul.f32 %v5054_v43, %v5054_v43 }
 0x5ce   : > { %v2850_v24 = vpop.xlane.xlu0 %2849 }
 0x5cf   : > { %v5062_v59 = vsub.f32 %v4063_v13, %v2876_v21  ;;  %v2873_v25 = vmul.f32 0.0078125, %v2850_v24  ;;  %2923 = vadd.xlane.f32.xlu1 %v2902_v23  ;;  %v2907_v26 = vmul.f32 %v5058_v20, %v5058_v20  ;;  %v5109_v24 = vld [vmem:[%s2831_s25] ss:$0 sm:$0xff] }
 0x5d0   : > { %v2852_v51 = vpop.xlane.xlu1 %2851 }
 0x5d1   : > { %v5067_v28 = vsub.f32 %v5010_v46, %v2873_v25  ;;  %v2874_v29 = vmul.f32 0.0078125, %v2852_v51  ;;  %2933 = vadd.xlane.f32.xlu0 %v2907_v26  ;;  %v2908_v30 = vmul.f32 %v5062_v59, %v5062_v59 }
 0x5d3   : > { %v5072_v34 = vsub.f32 %v5012_v47, %v2874_v29  ;;  %v2858_v35 = vpop.xlane.xlu0 %2857  ;;  %2935 = vadd.xlane.f32.xlu1 %v2908_v30  ;;  %v2905_v36 = vmul.f32 %v5067_v28, %v5067_v28 }
 0x5d4   : > { %v2877_v37 = vmul.f32 0.0078125, %v2858_v35 }
 0x5d5   : > { %2929 = vadd.xlane.f32.xlu0 %v2905_v36  ;;  %v2860_v58 = vpop.xlane.xlu1 %2859  ;;  %v2906_v42 = vmul.f32 %v5072_v34, %v5072_v34 }
 0x5d6   : > { %v5079_v19 = vsub.f32 %v5018_v49, %v2877_v37  ;;  %v2878_v39 = vmul.f32 0.0078125, %v2860_v58 }
 0x5d7   : > { %v2862_v44 = vpop.xlane.xlu0 %2861  ;;  %2931 = vadd.xlane.f32.xlu1 %v2906_v42 }
 0x5d8   : > { %v5082_v45 = vsub.f32 %v5023_v50, %v2878_v39  ;;  %v2879_v41 = vmul.f32 0.0078125, %v2862_v44  ;;  %v2909_v18 = vmul.f32 %v5079_v19, %v5079_v19 }
 0x5d9   : > { %v2864_v46 = vpop.xlane.xlu1 %2863 }
 0x5da   : > { %v5087_v13 = vsub.f32 %v5016_v33, %v2879_v41  ;;  %v2880_v47 = vmul.f32 0.0078125, %v2864_v46  ;;  %2937 = vadd.xlane.f32.xlu0 %v2909_v18  ;;  %v2910_v49 = vmul.f32 %v5082_v45, %v5082_v45  ;;  %v4358_v46 = vld [vmem:[#allocation2 + $0x10] sm:$0xff] }
 0x5dc   : > { %v5092_v53 = vsub.f32 %v5021_v52, %v2880_v47  ;;  %2939 = vadd.xlane.f32.xlu1 %v2910_v49  ;;  %v2911_v50 = vmul.f32 %v5087_v13, %v5087_v13 }
 0x5de   : > { %2941 = vadd.xlane.f32.xlu0 %v2911_v50  ;;  %v2912_v40 = vmul.f32 %v5092_v53, %v5092_v53 }
 0x5e0   : > { %2943 = vadd.xlane.f32.xlu1 %v2912_v40 }
 0x64e   : > { %v2918_v56 = vpop.xlane.xlu0 %2917 }
 0x64f   : > { %v2947_v33 = vmul.f32 0.0078125, %v2918_v56 }
 0x650   : > { %v2920_v48 = vpop.xlane.xlu1 %2919 }
 0x651   : > { %v2963_v22 = vadd.f32 1e-05, %v2947_v33  ;;  %v2948_v61 = vmul.f32 0.0078125, %v2920_v48 }
 0x652   : > { %v2914_v62 = vpop.xlane.xlu0 %2913 }
 0x653   : > { %4326 = vrsqrt.f32 %v2963_v22  ;;  %v2964_v55 = vadd.f32 1e-05, %v2948_v61  ;;  %v2945_v52 = vmul.f32 0.0078125, %v2914_v62 }
 0x654   : > { %v2916_v63 = vpop.xlane.xlu1 %2915 }
 0x655   : > { %4328 = vrsqrt.f32 %v2964_v55  ;;  %v2961_v57 = vadd.f32 1e-05, %v2945_v52  ;;  %v2946_v1 = vmul.f32 0.0078125, %v2916_v63 }
 0x656   : > { %v2926_v54 = vpop.xlane.xlu0 %2925 }
 0x657   : > { %4330 = vrsqrt.f32 %v2961_v57  ;;  %v2962_v38 = vadd.f32 1e-05, %v2946_v1  ;;  %v2951_v4 = vmul.f32 0.0078125, %v2926_v54  ;;  %v4360_v54 = vld [vmem:[#allocation2] sm:$0xff] }
 0x658   : > { %v2928_v31 = vpop.xlane.xlu1 %2927 }
 0x659   : > { %4332 = vrsqrt.f32 %v2962_v38  ;;  %v2967_v6 = vadd.f32 1e-05, %v2951_v4  ;;  %v2952_v7 = vmul.f32 0.0078125, %v2928_v31 }
 0x65a   : > { %v2922_v9 = vpop.xlane.xlu0 %2921 }
 0x65b   : > { %4334 = vrsqrt.f32 %v2967_v6  ;;  %v2968_v11 = vadd.f32 1e-05, %v2952_v7  ;;  %v2949_v12 = vmul.f32 0.0078125, %v2922_v9 }
 0x65c   : > { %v2924_v15 = vpop.xlane.xlu1 %2923 }
 0x65d   : > { %v4327_v32 = vpop.eup %4326  ;;  %4336 = vrsqrt.f32 %v2968_v11  ;;  %v2965_v17 = vadd.f32 1e-05, %v2949_v12  ;;  %v2950_v10 = vmul.f32 0.0078125, %v2924_v15 }
 0x65e   : > { %v2995_v5 = vmul.f32 %v4327_v32, %v5028_v27  ;;  %v2934_v21 = vpop.xlane.xlu0 %2933 }
 0x65f   : > { %v4329_v23 = vpop.eup %4328  ;;  %4338 = vrsqrt.f32 %v2965_v17  ;;  %v2966_v25 = vadd.f32 1e-05, %v2950_v10  ;;  %v2955_v26 = vmul.f32 0.0078125, %v2934_v21 }
 0x660   : > { %v3017_v51 = vmul.f32 %v5106_v16, %v2995_v5  ;;  %v2996_v29 = vmul.f32 %v4329_v23, %v5030_v60  ;;  %v2936_v30 = vpop.xlane.xlu1 %2935 }
 0x661   : > { %v4331_v35 = vpop.eup %4330  ;;  %4340 = vrsqrt.f32 %v2966_v25  ;;  %v2971_v36 = vadd.f32 1e-05, %v2955_v26  ;;  %v2956_v37 = vmul.f32 0.0078125, %v2936_v30 }
 0x662   : > { %v3039_v58 = vadd.f32 %v5109_v24, %v3017_v51  ;;  %v3018_v27 = vmul.f32 %v5106_v16, %v2996_v29  ;;  %v2993_v42 = vmul.f32 %v4331_v35, %v5034_v0  ;;  %v2930_v39 = vpop.xlane.xlu0 %2929  ;;  %v4359_v0 = vld [vmem:[#allocation2 + $0x18] sm:$0xff]  ;;  %v4362_v35 = vld [vmem:[#allocation2 + $0x30] sm:$0xff] }
 0x663   : > { %v4333_v44 = vpop.eup %4332  ;;  %4342 = vrsqrt.f32 %v2971_v36  ;;  %v2972_v41 = vadd.f32 1e-05, %v2956_v37  ;;  %v2953_v18 = vmul.f32 0.0078125, %v2930_v39 }
 0x664   : > { %v3055_v47 = vadd.f32 %v4358_v46, %v3039_v58  ;;  %v3040_v60 = vadd.f32 %v5109_v24, %v3018_v27  ;;  %v3015_v49 = vmul.f32 %v5106_v16, %v2993_v42  ;;  %v2994_v50 = vmul.f32 %v4333_v44, %v5038_v2  ;;  %v2932_v40 = vpop.xlane.xlu1 %2931  ;;  %v4363_v27 = vld [vmem:[#allocation2 + $0x38] sm:$0xff] }
 0x665   : > { %v4335_v56 = vpop.eup %4334  ;;  %4344 = vrsqrt.f32 %v2972_v41  ;;  %v2969_v33 = vadd.f32 1e-05, %v2953_v18  ;;  %v2954_v48 = vmul.f32 0.0078125, %v2932_v40 }
 0x666   : > { %v3071_v22 = vmax.f32 %v3055_v47, 0.0  ;;  %v3056_v61 = vadd.f32 %v4359_v0, %v3040_v60  ;;  %v3037_v62 = vadd.f32 %v5109_v24, %v3015_v49  ;;  %v3016_v55 = vmul.f32 %v5106_v16, %v2994_v50  ;;  %v4364_v49 = vld [vmem:[#allocation2 + $0x20] sm:$0xff]  ;;  %v4365_v0 = vld [vmem:[#allocation2 + $0x28] sm:$0xff] }
 0x667   : > { %v4337_v52 = vpop.eup %4336  ;;  %v2999_v63 = vmul.f32 %v4335_v56, %v5042_v3  ;;  %4346 = vrsqrt.f32 %v2969_v33  ;;  %v2970_v57 = vadd.f32 1e-05, %v2954_v48  ;;  %v2938_v1 = vpop.xlane.xlu0 %2937  ;;  %v4361_v3 = vld [vmem:[#allocation2 + $0x8] sm:$0xff] }
 0x668   : > { %3087 = vst [vmem:[#allocation2 + $0x10] sm:$0xff] %v3071_v22  ;;  %v3072_v2 = vmax.f32 %v3056_v61, 0.0  ;;  %v3053_v38 = vadd.f32 %v4360_v54, %v3037_v62  ;;  %v3038_v4 = vadd.f32 %v5109_v24, %v3016_v55  ;;  %v3000_v31 = vmul.f32 %v4337_v52, %v5046_v8 }
 0x669   : > { %v4339_v6 = vpop.eup %4338  ;;  %v3021_v7 = vmul.f32 %v5106_v16, %v2999_v63  ;;  %4348 = vrsqrt.f32 %v2970_v57  ;;  %v2957_v9 = vmul.f32 0.0078125, %v2938_v1  ;;  %v2940_v11 = vpop.xlane.xlu1 %2939  ;;  %v4366_v1 = vld [vmem:[#allocation2 + $0x50] sm:$0xff] }
 0x66a   : > { %3088 = vst [vmem:[#allocation2 + $0x18] sm:$0xff] %v3072_v2  ;;  %v3069_v12 = vmax.f32 %v3053_v38, 0.0  ;;  %v3054_v15 = vadd.f32 %v4361_v3, %v3038_v4  ;;  %v3022_v32 = vmul.f32 %v5106_v16, %v3000_v31  ;;  %v2997_v17 = vmul.f32 %v4339_v6, %v5050_v14 }
 0x66b   : > { %v4341_v10 = vpop.eup %4340  ;;  %v3043_v5 = vadd.f32 %v5109_v24, %v3021_v7  ;;  %v2973_v21 = vadd.f32 1e-05, %v2957_v9  ;;  %v2958_v23 = vmul.f32 0.0078125, %v2940_v11  ;;  %v2942_v8 = vpop.xlane.xlu0 %2941  ;;  %v4367_v7 = vld [vmem:[#allocation2 + $0x58] sm:$0xff]  ;;  %v4368_v11 = vld [vmem:[#allocation2 + $0x40] sm:$0xff] }
 0x66c   : > { %3085 = vst [vmem:[#allocation2] sm:$0xff] %v3069_v12  ;;  %v3070_v25 = vmax.f32 %v3054_v15, 0.0  ;;  %v3044_v26 = vadd.f32 %v5109_v24, %v3022_v32  ;;  %v3019_v51 = vmul.f32 %v5106_v16, %v2997_v17  ;;  %v2998_v29 = vmul.f32 %v4341_v10, %v5054_v43  ;;  %v4369_v10 = vld [vmem:[#allocation2 + $0x48] sm:$0xff] }
 0x66d   : > { %v4343_v30 = vpop.eup %4342  ;;  %v3059_v36 = vadd.f32 %v4362_v35, %v3043_v5  ;;  %4350 = vrsqrt.f32 %v2973_v21  ;;  %v2974_v37 = vadd.f32 1e-05, %v2958_v23  ;;  %v2959_v14 = vmul.f32 0.0078125, %v2942_v8  ;;  %v2944_v58 = vpop.xlane.xlu1 %2943 }
 0x66e   : > { %3086 = vst [vmem:[#allocation2 + $0x8] sm:$0xff] %v3070_v25  ;;  %v3060_v42 = vadd.f32 %v4363_v27, %v3044_v26  ;;  %v3041_v39 = vadd.f32 %v5109_v24, %v3019_v51  ;;  %v3020_v44 = vmul.f32 %v5106_v16, %v2998_v29  ;;  %v3003_v41 = vmul.f32 %v4343_v30, %v5058_v20  ;;  %v4370_v30 = vld [vmem:[#allocation2 + $0x60] sm:$0xff] }
 0x66f   : > { %v4345_v18 = vpop.eup %4344  ;;  %v3075_v46 = vmax.f32 %v3059_v36, 0.0  ;;  %4352 = vrsqrt.f32 %v2974_v37  ;;  %v2975_v43 = vadd.f32 1e-05, %v2959_v14  ;;  %v2960_v47 = vmul.f32 0.0078125, %v2944_v58  ;;  %v4371_v58 = vld [vmem:[#allocation2 + $0x68] sm:$0xff] }
 0x670   : > { %v3076_v60 = vmax.f32 %v3060_v42, 0.0  ;;  %v3057_v50 = vadd.f32 %v4364_v49, %v3041_v39  ;;  %v3042_v40 = vadd.f32 %v5109_v24, %v3020_v44  ;;  %v3025_v56 = vmul.f32 %v5106_v16, %v3003_v41  ;;  %v3103_v49 = vld [vmem:[#allocation2 + $0x10] sm:$0xff] (%p136_p12) }
 0x671   : > { %v4347_v33 = vpop.eup %4346  ;;  %3091 = vst [vmem:[#allocation2 + $0x30] sm:$0xff] %v3075_v46  ;;  %v3004_v48 = vmul.f32 %v4345_v18, %v5062_v59  ;;  %4354 = vrsqrt.f32 %v2975_v43  ;;  %v2976_v22 = vadd.f32 1e-05, %v2960_v47  ;;  %v4373_v43 = vld [vmem:[#allocation2 + $0x78] sm:$0xff]  ;;  %3119 = vst [vmem:[#allocation12 + $0x10] sm:$0xff] (%p136_p12), %v3103_v49 }
 0x672   : > { %3092 = vst [vmem:[#allocation2 + $0x38] sm:$0xff] %v3076_v60  ;;  %v3073_v20 = vmax.f32 %v3057_v50, 0.0  ;;  %v3058_v61 = vadd.f32 %v4365_v0, %v3042_v40  ;;  %v3047_v62 = vadd.f32 %v5109_v24, %v3025_v56  ;;  %v3001_v55 = vmul.f32 %v4347_v33, %v5067_v28 }
 0x673   : > { %v4349_v52 = vpop.eup %4348  ;;  %v3026_v63 = vmul.f32 %v5106_v16, %v3004_v48  ;;  %4356 = vrsqrt.f32 %v2976_v22 }
 0x674   : > { %3089 = vst [vmem:[#allocation2 + $0x20] sm:$0xff] %v3073_v20  ;;  %v3074_v57 = vmax.f32 %v3058_v61, 0.0  ;;  %v3063_v2 = vadd.f32 %v4366_v1, %v3047_v62  ;;  %v3023_v59 = vmul.f32 %v5106_v16, %v3001_v55  ;;  %v3002_v54 = vmul.f32 %v4349_v52, %v5072_v34 }
 0x675   : > { %v3048_v38 = vadd.f32 %v5109_v24, %v3026_v63 }
 0x676   : > { %3090 = vst [vmem:[#allocation2 + $0x28] sm:$0xff] %v3074_v57  ;;  %v3079_v4 = vmax.f32 %v3063_v2, 0.0  ;;  %v3045_v31 = vadd.f32 %v5109_v24, %v3023_v59  ;;  %v3024_v28 = vmul.f32 %v5106_v16, %v3002_v54 }
 0x677   : > { %v4351_v6 = vpop.eup %4350  ;;  %v3064_v9 = vadd.f32 %v4367_v7, %v3048_v38 }
 0x678   : > { %3095 = vst [vmem:[#allocation2 + $0x50] sm:$0xff] %v3079_v4  ;;  %v3061_v12 = vadd.f32 %v4368_v11, %v3045_v31  ;;  %v3046_v3 = vadd.f32 %v5109_v24, %v3024_v28  ;;  %v3005_v15 = vmul.f32 %v4351_v6, %v5079_v19  ;;  %v3107_v56 = vld [vmem:[#allocation2 + $0x30] sm:$0xff] (%p136_p12) }
 0x679   : > { %v4353_v32 = vpop.eup %4352  ;;  %v3080_v34 = vmax.f32 %v3064_v9, 0.0  ;;  %v3108_v33 = vld [vmem:[#allocation2 + $0x38] sm:$0xff] (%p136_p12)  ;;  %3123 = vst [vmem:[#allocation12 + $0x30] sm:$0xff] (%p136_p12), %v3107_v56 }
 0x67a   : > { %v3077_v17 = vmax.f32 %v3061_v12, 0.0  ;;  %v3062_v5 = vadd.f32 %v4369_v10, %v3046_v3  ;;  %v3027_v21 = vmul.f32 %v5106_v16, %v3005_v15  ;;  %v3006_v23 = vmul.f32 %v4353_v32, %v5082_v45  ;;  %3124 = vst [vmem:[#allocation12 + $0x38] sm:$0xff] (%p136_p12), %v3108_v33 }
 0x67b   : > { %v4355_v8 = vpop.eup %4354  ;;  %3096 = vst [vmem:[#allocation2 + $0x58] sm:$0xff] %v3080_v34  ;;  %v3105_v50 = vld [vmem:[#allocation2 + $0x20] sm:$0xff] (%p136_p12) }
 0x67c   : > { %3093 = vst [vmem:[#allocation2 + $0x40] sm:$0xff] %v3077_v17  ;;  %v3078_v25 = vmax.f32 %v3062_v5, 0.0  ;;  %v3049_v26 = vadd.f32 %v5109_v24, %v3027_v21  ;;  %v3028_v51 = vmul.f32 %v5106_v16, %v3006_v23  ;;  %v3007_v29 = vmul.f32 %v4355_v8, %v5087_v13  ;;  %v4372_v13 = vld [vmem:[#allocation2 + $0x70] sm:$0xff]  ;;  %3121 = vst [vmem:[#allocation12 + $0x20] sm:$0xff] (%p136_p12), %v3105_v50 }
 0x67d   : > { %v4357_v19 = vpop.eup %4356  ;;  %v3106_v40 = vld [vmem:[#allocation2 + $0x28] sm:$0xff] (%p136_p12) }
 0x67e   : > { %3094 = vst [vmem:[#allocation2 + $0x48] sm:$0xff] %v3078_v25  ;;  %v3065_v35 = vadd.f32 %v4370_v30, %v3049_v26  ;;  %v3050_v36 = vadd.f32 %v5109_v24, %v3028_v51  ;;  %v3029_v37 = vmul.f32 %v5106_v16, %v3007_v29  ;;  %v3008_v45 = vmul.f32 %v4357_v19, %v5092_v53  ;;  %v3101_v53 = vld [vmem:[#allocation2] sm:$0xff] (%p136_p12) }
 0x67f   :  { %3117 = vst [vmem:[#allocation12] sm:$0xff] (%p136_p12), %v3101_v53  ;;  %3122 = vst [vmem:[#allocation12 + $0x28] sm:$0xff] (%p136_p12), %v3106_v40  ;;  %v3111_v20 = vld [vmem:[#allocation2 + $0x50] sm:$0xff] (%p136_p12) }
 0x680   : > { %v3081_v14 = vmax.f32 %v3065_v35, 0.0  ;;  %v3066_v27 = vadd.f32 %v4371_v58, %v3050_v36  ;;  %v3051_v42 = vadd.f32 %v5109_v24, %v3029_v37  ;;  %v3030_v39 = vmul.f32 %v5106_v16, %v3008_v45  ;;  %v3102_v16 = vld [vmem:[#allocation2 + $0x8] sm:$0xff] (%p136_p12)  ;;  %3127 = vst [vmem:[#allocation12 + $0x50] sm:$0xff] (%p136_p12), %v3111_v20 }
 0x681   :  { %3118 = vst [vmem:[#allocation12 + $0x8] sm:$0xff] (%p136_p12), %v3102_v16 }
 0x682   : > { %3097 = vst [vmem:[#allocation2 + $0x60] sm:$0xff] %v3081_v14  ;;  %v3082_v44 = vmax.f32 %v3066_v27, 0.0  ;;  %v3067_v41 = vadd.f32 %v4372_v13, %v3051_v42  ;;  %v3052_v18 = vadd.f32 %v5109_v24, %v3030_v39  ;;  %138 = sbr.rel (!%p136_p12) target bundleno = 99 (0x63), region = 100  ;;  %v3104_v24 = vld [vmem:[#allocation2 + $0x18] sm:$0xff] (%p136_p12) }
 0x683   :  { %3120 = vst [vmem:[#allocation12 + $0x18] sm:$0xff] (%p136_p12), %v3104_v24  ;;  %v3109_v48 = vld [vmem:[#allocation2 + $0x40] sm:$0xff] (%p136_p12)  ;;  %v3112_v0 = vld [vmem:[#allocation2 + $0x58] sm:$0xff] (%p136_p12) }
 0x684   : > { %3098 = vst [vmem:[#allocation2 + $0x68] sm:$0xff] %v3082_v44  ;;  %v3083_v46 = vmax.f32 %v3067_v41, 0.0  ;;  %v3068_v47 = vadd.f32 %v4373_v43, %v3052_v18  ;;  %3125 = vst [vmem:[#allocation12 + $0x40] sm:$0xff] (%p136_p12), %v3109_v48 }
 0x685   :  { %v3110_v22 = vld [vmem:[#allocation2 + $0x48] sm:$0xff] (%p136_p12)  ;;  %3128 = vst [vmem:[#allocation12 + $0x58] sm:$0xff] (%p136_p12), %v3112_v0 }
 0x686   : > { %3099 = vst [vmem:[#allocation2 + $0x70] sm:$0xff] %v3083_v46  ;;  %v3084_v60 = vmax.f32 %v3068_v47, 0.0  ;;  %3126 = vst [vmem:[#allocation12 + $0x48] sm:$0xff] (%p136_p12), %v3110_v22 }
 0x688   : > { %3100 = vst [vmem:[#allocation2 + $0x78] sm:$0xff] %v3084_v60 }
 0x689   :  { %v3113_v61 = vld [vmem:[#allocation2 + $0x60] sm:$0xff] }
 0x68a   :  { %3129 = vst [vmem:[#allocation12 + $0x60] sm:$0xff] %v3113_v61 }
 0x68b   :  { %v3114_v62 = vld [vmem:[#allocation2 + $0x68] sm:$0xff] }
 0x68c   :  { %3130 = vst [vmem:[#allocation12 + $0x68] sm:$0xff] %v3114_v62 }
 0x68d   :  { %v3115_v55 = vld [vmem:[#allocation2 + $0x70] sm:$0xff] }
 0x68e   :  { %3131 = vst [vmem:[#allocation12 + $0x70] sm:$0xff] %v3115_v55 }
 0x68f   :  { %v3116_v52 = vld [vmem:[#allocation2 + $0x78] sm:$0xff] }
 0x690   :  { %3132 = vst [vmem:[#allocation12 + $0x78] sm:$0xff] %v3116_v52 }
 0x691   :  { %4495 = shalt.err (!%p4492_p3)
}
 0x692   :  { %s4496_s7 = scalar_lea.hbm %s5185_s9, 2048 }
 0x693   :  { %p4497_p4 = scmp.ne.s32.totalorder %s5185_s9, %s4496_s7  ;;  %p4500_p5 = scmp.lt.u32.totalorder %s4496_s7, %s5185_s9 }
 0x695   :  { %p4502_p6 = pnand %p4500_p5, %p4497_p4 }
 0x697   :  { %4505 = shalt.err (!%p4502_p6)
}
 0x698   :  { %3144 = dma.vmem_to_hbm [thread:$0]  %s3139_s28, 2048, %s5185_s9, [#allocation5], %s4527_s3, %s4527_s3, %s4528_s24  }
 0x699   :  { %4516 = dma.done.wait [#allocation5], 2048  }
 0x69a   :  { %4517 = vsyncadd [#allocation5], 4294965248 }
 0x69b   :  { %3148 = vsyncpa [#allocation4], 1 }
 0x69c   :  { %3149 = vsyncpa [#allocation7], 1 }
 0x69d   :  { %3150 = vsyncpa [#allocation10], 1 }
 0x69e   :  { %3151 = vsyncpa [#allocation5], 1 }

</bundles_post_ra>
